<compile_context>
chip_gen: v5e
topology: v5e:2x2
jax: 0.10.0
libtpu: 0.0.40
codegen_flags: <defaults>
</compile_context>

<pallas_src>
import functools

import jax
import jax.numpy as jnp
from jax.experimental import pallas as pl
from jax.experimental.pallas import tpu as pltpu


_VMEM_LIMIT = 48 * 1024 * 1024   # headroom below v7x's 64 MiB physical VMEM
_LANE = 128


def _round_up(x, m):
    return ((x + m - 1) // m) * m


# ----------------------------------------------------------------------------
# XLA-side glue: transpose-free im2col from the resident (C, B, H, W) layout.
# Each tap is a strided slice + free reshape; rows ordered (kh, kw, cin).
# ----------------------------------------------------------------------------
def _im2col(x_cbhw, k, stride, padding):
    C, B, _, _ = x_cbhw.shape
    if padding:
        x_cbhw = jnp.pad(
            x_cbhw, ((0, 0), (0, 0), (padding, padding), (padding, padding)))
    Hp, Wp = x_cbhw.shape[2], x_cbhw.shape[3]
    Ho = (Hp - k) // stride + 1
    Wo = (Wp - k) // stride + 1
    N = B * Ho * Wo
    cols = []
    for kh in range(k):
        for kw in range(k):
            tap = x_cbhw[:, :,
                         kh:kh + stride * (Ho - 1) + 1:stride,
                         kw:kw + stride * (Wo - 1) + 1:stride]   # (C,B,Ho,Wo)
            cols.append(tap.reshape(C, N))                        # free reshape
    patches = jnp.concatenate(cols, axis=0)                       # (k*k*C, N)
    return patches, (B, Ho, Wo)


def _fold_weight(w):
    """(Cout, Cin, K, K) -> (Cout, K*K*Cin) matching the (kh, kw, cin) row order."""
    Cout, Cin, K, _ = w.shape
    return jnp.transpose(w, (0, 2, 3, 1)).reshape(Cout, K * K * Cin).astype(
        jnp.float32)


# ----------------------------------------------------------------------------
# Kernels
# ----------------------------------------------------------------------------
def _batch_stats(x, n_valid, n_pad):
    """Biased batch mean/var over the lane axis, masking padded columns."""
    if n_valid == n_pad:
        mean = jnp.mean(x, axis=1, keepdims=True)
        diff = x - mean
        var = jnp.mean(diff * diff, axis=1, keepdims=True)
    else:
        lane = jax.lax.broadcasted_iota(jnp.int32, x.shape, 1)
        mask = lane < n_valid
        inv_n = 1.0 / float(n_valid)
        mean = jnp.sum(jnp.where(mask, x, 0.0), axis=1, keepdims=True) * inv_n
        diff = x - mean
        var = jnp.sum(jnp.where(mask, diff * diff, 0.0),
                      axis=1, keepdims=True) * inv_n
    return diff, var


def _conv_kernel(p_ref, w_ref, b_ref, o_ref, *, act, slope):
    # p: (Kc, TN) bf16, w: (Cout, Kc) f32, b: (Cout, 1) f32 -> o: (Cout, TN)
    p = p_ref[...].astype(jnp.float32)
    acc = jnp.dot(w_ref[...], p, preferred_element_type=jnp.float32) + b_ref[...]
    if act == "leaky":
        acc = jnp.where(acc >= 0.0, acc, slope * acc)
    elif act == "sigmoid":
        acc = jax.nn.sigmoid(acc)
    o_ref[...] = acc.astype(o_ref.dtype)


def _conv_bn_lrelu_kernel(p_ref, w_ref, b_ref, g_ref, bb_ref, o_ref, *,
                          n_valid, eps, slope):
    # Single-block conv + fused BatchNorm (batch stats) + LeakyReLU epilogue.
    p = p_ref[...].astype(jnp.float32)
    acc = jnp.dot(w_ref[...], p, preferred_element_type=jnp.float32) + b_ref[...]
    diff, var = _batch_stats(acc, n_valid, acc.shape[1])
    y = diff * jax.lax.rsqrt(var + eps) * g_ref[...] + bb_ref[...]
    y = jnp.where(y >= 0.0, y, slope * y)
    o_ref[...] = y.astype(o_ref.dtype)


def _bn_lrelu_kernel(x_ref, g_ref, b_ref, o_ref, *, n_valid, eps, slope):
    x = x_ref[...].astype(jnp.float32)
    diff, var = _batch_stats(x, n_valid, x.shape[1])
    y = diff * jax.lax.rsqrt(var + eps) * g_ref[...] + b_ref[...]
    y = jnp.where(y >= 0.0, y, slope * y)
    o_ref[...] = y.astype(o_ref.dtype)


# ----------------------------------------------------------------------------
# Conv wrappers.  Input / output layout: (C, B, H, W).
# ----------------------------------------------------------------------------
def conv2d(x_cbhw, w, b, *, stride, padding, act="none", slope=0.2,
           out_dtype=jnp.float32, tn_max=1024):
    Cout = w.shape[0]
    patches, (B, Ho, Wo) = _im2col(x_cbhw, w.shape[2], stride, padding)
    Kc, N = patches.shape

    # Lane-dense tile; pad N up to a tile multiple (never shrink the tile).
    tn = min(tn_max, _round_up(N, _LANE))
    n_pad = _round_up(N, tn)
    if n_pad != N:
        patches = jnp.pad(patches, ((0, 0), (0, n_pad - N)))
    grid = (n_pad // tn,)

    w_fold = _fold_weight(w)
    b2 = b.reshape(Cout, 1).astype(jnp.float32)

    out = pl.pallas_call(
        functools.partial(_conv_kernel, act=act, slope=slope),
        out_shape=jax.ShapeDtypeStruct((Cout, n_pad), out_dtype),
        grid=grid,
        in_specs=[
            pl.BlockSpec((Kc, tn), lambda i: (0, i)),     # pipelined im2col tile
            pl.BlockSpec((Cout, Kc), lambda i: (0, 0)),   # resident weights
            pl.BlockSpec((Cout, 1), lambda i: (0, 0)),    # resident bias
        ],
        out_specs=pl.BlockSpec((Cout, tn), lambda i: (0, i)),
        compiler_params=pltpu.CompilerParams(
            dimension_semantics=("parallel",),
            vmem_limit_bytes=_VMEM_LIMIT),
    )(patches, w_fold, b2)

    if n_pad != N:
        out = out[:, :N]
    return out.reshape(Cout, B, Ho, Wo)


def conv2d_bn_lrelu(x_cbhw, w, b, gamma, beta, *, stride, padding, eps=1e-5,
                    slope=0.2, out_dtype=jnp.float32,
                    fused_block_bytes=16 * 1024 * 1024):
    Cout = w.shape[0]
    patches, (B, Ho, Wo) = _im2col(x_cbhw, w.shape[2], stride, padding)
    Kc, N = patches.shape
    n_pad = _round_up(N, _LANE)

    if Kc * n_pad * patches.dtype.itemsize > fused_block_bytes:
        # TODO(synk): two-pass tiled-N (sum, sumsq) statistics for very large
        # activations; never hit at discriminator sizes.
        y = conv2d(x_cbhw, w, b, stride=stride, padding=padding, act="none",
                   out_dtype=jnp.float32)
        return batchnorm_lrelu(y, gamma, beta, eps=eps, slope=slope,
                               out_dtype=out_dtype)

    if n_pad != N:
        patches = jnp.pad(patches, ((0, 0), (0, n_pad - N)))
    w_fold = _fold_weight(w)
    b2 = b.reshape(Cout, 1).astype(jnp.float32)
    g2 = gamma.reshape(Cout, 1).astype(jnp.float32)
    bb2 = beta.reshape(Cout, 1).astype(jnp.float32)

    out = pl.pallas_call(
        functools.partial(_conv_bn_lrelu_kernel, n_valid=N, eps=eps, slope=slope),
        out_shape=jax.ShapeDtypeStruct((Cout, n_pad), out_dtype),
        grid=(1,),
        in_specs=[
            pl.BlockSpec((Kc, n_pad), lambda i: (0, 0)),
            pl.BlockSpec((Cout, Kc), lambda i: (0, 0)),
            pl.BlockSpec((Cout, 1), lambda i: (0, 0)),
            pl.BlockSpec((Cout, 1), lambda i: (0, 0)),
            pl.BlockSpec((Cout, 1), lambda i: (0, 0)),
        ],
        out_specs=pl.BlockSpec((Cout, n_pad), lambda i: (0, 0)),
        compiler_params=pltpu.CompilerParams(
            dimension_semantics=("arbitrary",),
            vmem_limit_bytes=_VMEM_LIMIT),
    )(patches, w_fold, b2, g2, bb2)

    if n_pad != N:
        out = out[:, :N]
    return out.reshape(Cout, B, Ho, Wo)


def batchnorm_lrelu(x_cbhw, gamma, beta, *, eps=1e-5, slope=0.2,
                    out_dtype=jnp.float32):
    """Fallback standalone BN+LReLU (only used when conv+BN can't be fused)."""
    C, B, H, W = x_cbhw.shape
    N = B * H * W
    n_pad = _round_up(N, _LANE)
    x = x_cbhw.reshape(C, N)
    if n_pad != N:
        x = jnp.pad(x, ((0, 0), (0, n_pad - N)))
    out = pl.pallas_call(
        functools.partial(_bn_lrelu_kernel, n_valid=N, eps=eps, slope=slope),
        out_shape=jax.ShapeDtypeStruct((C, n_pad), out_dtype),
        grid=(1,),
        in_specs=[
            pl.BlockSpec((C, n_pad), lambda i: (0, 0)),
            pl.BlockSpec((C, 1), lambda i: (0, 0)),
            pl.BlockSpec((C, 1), lambda i: (0, 0)),
        ],
        out_specs=pl.BlockSpec((C, n_pad), lambda i: (0, 0)),
        compiler_params=pltpu.CompilerParams(
            dimension_semantics=("arbitrary",),
            vmem_limit_bytes=_VMEM_LIMIT),
    )(x, gamma.reshape(C, 1).astype(jnp.float32),
      beta.reshape(C, 1).astype(jnp.float32))
    if n_pad != N:
        out = out[:, :N]
    return out.reshape(C, B, H, W)


# ----------------------------------------------------------------------------
# Parameters (deterministic synthetic init; shapes from the PyTorch __init__).
# ----------------------------------------------------------------------------
def init_params(key, input_nc, ndf):
    ks = iter(jax.random.split(key, 32))

    def conv(cin, cout, k):
        return {"w": 0.05 * jax.random.normal(next(ks), (cout, cin, k, k), jnp.float32),
                "b": 0.05 * jax.random.normal(next(ks), (cout,), jnp.float32)}

    def bn(c):
        return {"gamma": 1.0 + 0.1 * jax.random.normal(next(ks), (c,), jnp.float32),
                "beta": 0.1 * jax.random.normal(next(ks), (c,), jnp.float32)}

    return {
        "conv1": conv(input_nc, ndf, 3),
        "conv2": conv(ndf, 2 * ndf, 3), "bn2": bn(2 * ndf),
        "conv3": conv(2 * ndf, 4 * ndf, 3), "bn3": bn(4 * ndf),
        "conv4": conv(4 * ndf, 4 * ndf, 3), "bn4": bn(4 * ndf),
        "conv5": conv(4 * ndf, 1, 4),
    }


# ----------------------------------------------------------------------------
# Forward pass (mirrors nn.Sequential of Discriminator_edges).
# ----------------------------------------------------------------------------
def discriminator_edges_forward(params, x_nchw, use_sigmoid=False):
    # NCHW -> resident (C, B, H, W) layout (single tiny boundary transpose).
    x = jnp.transpose(x_nchw, (1, 0, 2, 3)).astype(jnp.bfloat16)

    # Conv(k3 s2 p1) + LeakyReLU fused into the conv epilogue (no norm layer).
    x = conv2d(x, params["conv1"]["w"], params["conv1"]["b"],
               stride=2, padding=1, act="leaky", out_dtype=jnp.bfloat16)

    # 3 x (Conv(k3 s2 p1) + BatchNorm + LeakyReLU), BN fused in the epilogue.
    for i in (2, 3, 4):
        x = conv2d_bn_lrelu(x, params[f"conv{i}"]["w"], params[f"conv{i}"]["b"],
                            params[f"bn{i}"]["gamma"], params[f"bn{i}"]["beta"],
                            stride=2, padding=1, out_dtype=jnp.bfloat16)

    # Conv(k4 s1 p0) [+ optional Sigmoid]; keep logits in f32.
    x = conv2d(x, params["conv5"]["w"], params["conv5"]["b"],
               stride=1, padding=0,
               act="sigmoid" if use_sigmoid else "none", out_dtype=jnp.float32)

    # (1, B, 1, 1) -> (B, 1, 1, 1)  (NCHW module output)
    return jnp.transpose(x, (1, 0, 2, 3))


if __name__ == "__main__":
    # input_nc = 4 (1-ch edge map + 3-ch photo concatenated); small ndf.
    # Spatial 64 is the minimum that keeps the final k=4 valid conv well-defined
    # (64 -> 32 -> 16 -> 8 -> 4 -> 1).
    B, input_nc, ndf, H, W = 2, 4, 8, 64, 64
    key = jax.random.PRNGKey(0)
    k_params, k_x = jax.random.split(key)

    params = init_params(k_params, input_nc, ndf)
    x = jax.random.normal(k_x, (B, input_nc, H, W), jnp.float32)

    fwd = jax.jit(functools.partial(discriminator_edges_forward, use_sigmoid=False))
    out = fwd(params, x)
    jax.block_until_ready(out)

    assert out.shape == (B, 1, 1, 1), out.shape
    assert bool(jnp.all(jnp.isfinite(out)))
    print("KERNEL_OK")
</pallas_src>

<mosaic_0001>
module attributes {stable_mosaic.version = 11 : i64} {
  func.func @_conv_kernel(%arg0: i32, %arg1: memref<36x1024xbf16, #tpu.memory_space<vmem>>, %arg2: memref<8x36xf32, #tpu.memory_space<vmem>>, %arg3: memref<8x1xf32, #tpu.memory_space<vmem>>, %arg4: memref<8x1024xbf16, #tpu.memory_space<vmem>>) attributes {dimension_semantics = [#tpu.dimension_semantics<parallel>], iteration_bounds = array<i64: 2>, scalar_prefetch = 0 : i64, scratch_operands = 0 : i64, tpu.core_type = #tpu.core_type<tc>, window_params = [{transform_indices = @transform_0, window_bounds = array<i64: 36, 1024>}, {pipeline_mode = #tpu.pipeline_mode<synchronous>, transform_indices = @transform_1, window_bounds = array<i64: 8, 36>}, {pipeline_mode = #tpu.pipeline_mode<synchronous>, transform_indices = @transform_2, window_bounds = array<i64: 8, 1>}, {transform_indices = @transform_3, window_bounds = array<i64: 8, 1024>}]} {
    %c0 = arith.constant 0 : index
    %c0_0 = arith.constant 0 : index
    %0 = vector.load %arg1[%c0, %c0_0] : memref<36x1024xbf16, #tpu.memory_space<vmem>>, vector<36x1024xbf16>
    %1 = arith.extf %0 : vector<36x1024xbf16> to vector<36x1024xf32>
    %c0_1 = arith.constant 0 : index
    %c0_2 = arith.constant 0 : index
    %2 = vector.load %arg2[%c0_1, %c0_2] : memref<8x36xf32, #tpu.memory_space<vmem>>, vector<8x36xf32>
    %cst = arith.constant dense<0.000000e+00> : vector<8x1024xf32>
    %3 = tpu.matmul %2, %1, %cst {dimension_numbers = #tpu.dot_dimension_numbers<[1], [0], [0], [1], [0, 0, 1, 1], [], []>} : vector<8x36xf32>, vector<36x1024xf32>, vector<8x1024xf32> -> vector<8x1024xf32>
    %c0_3 = arith.constant 0 : index
    %c0_4 = arith.constant 0 : index
    %4 = vector.load %arg3[%c0_3, %c0_4] : memref<8x1xf32, #tpu.memory_space<vmem>>, vector<8x1xf32>
    %5 = vector.broadcast %4 : vector<8x1xf32> to vector<8x1024xf32>
    %6 = arith.addf %3, %5 : vector<8x1024xf32>
    %cst_5 = arith.constant 0.000000e+00 : f32
    %7 = vector.broadcast %cst_5 : f32 to vector<8x1024xf32>
    %8 = arith.cmpf oge, %6, %7 : vector<8x1024xf32>
    %cst_6 = arith.constant 2.000000e-01 : f32
    %9 = vector.broadcast %cst_6 : f32 to vector<8x1024xf32>
    %10 = arith.mulf %9, %6 : vector<8x1024xf32>
    %11 = arith.select %8, %6, %10 : vector<8x1024xi1>, vector<8x1024xf32>
    %12 = arith.truncf %11 : vector<8x1024xf32> to vector<8x1024xbf16>
    %c0_7 = arith.constant 0 : index
    %c0_8 = arith.constant 0 : index
    %13 = vector.load %arg4[%c0_7, %c0_8] : memref<8x1024xbf16, #tpu.memory_space<vmem>>, vector<8x1024xbf16>
    tpu.vector_store %arg4[%c0_7, %c0_8], %12 {strides = array<i32>} : memref<8x1024xbf16, #tpu.memory_space<vmem>>, vector<8x1024xbf16>,
    return
  }
  func.func @transform_0(%arg0: i32) -> (i32, i32) {
    %c0_i32 = arith.constant 0 : i32
    %c0_i32_0 = arith.constant 0 : i32
    return %c0_i32, %arg0 : i32, i32
  }
  func.func @transform_1(%arg0: i32) -> (i32, i32) {
    %c0_i32 = arith.constant 0 : i32
    %c0_i32_0 = arith.constant 0 : i32
    %c0_i32_1 = arith.constant 0 : i32
    return %c0_i32, %c0_i32_0 : i32, i32
  }
  func.func @transform_2(%arg0: i32) -> (i32, i32) {
    %c0_i32 = arith.constant 0 : i32
    %c0_i32_0 = arith.constant 0 : i32
    %c0_i32_1 = arith.constant 0 : i32
    return %c0_i32, %c0_i32_0 : i32, i32
  }
  func.func @transform_3(%arg0: i32) -> (i32, i32) {
    %c0_i32 = arith.constant 0 : i32
    %c0_i32_0 = arith.constant 0 : i32
    return %c0_i32, %arg0 : i32, i32
  }
}

module attributes {stable_mosaic.version = 11 : i64} {
  func.func @_conv_bn_lrelu_kernel(%arg0: i32, %arg1: memref<72x512xbf16, #tpu.memory_space<vmem>>, %arg2: memref<16x72xf32, #tpu.memory_space<vmem>>, %arg3: memref<16x1xf32, #tpu.memory_space<vmem>>, %arg4: memref<16x1xf32, #tpu.memory_space<vmem>>, %arg5: memref<16x1xf32, #tpu.memory_space<vmem>>, %arg6: memref<16x512xbf16, #tpu.memory_space<vmem>>) attributes {dimension_semantics = [#tpu.dimension_semantics<arbitrary>], iteration_bounds = array<i64: 1>, scalar_prefetch = 0 : i64, scratch_operands = 0 : i64, tpu.core_type = #tpu.core_type<tc>, window_params = [{pipeline_mode = #tpu.pipeline_mode<synchronous>, transform_indices = @transform_0, window_bounds = array<i64: 72, 512>}, {pipeline_mode = #tpu.pipeline_mode<synchronous>, transform_indices = @transform_1, window_bounds = array<i64: 16, 72>}, {pipeline_mode = #tpu.pipeline_mode<synchronous>, transform_indices = @transform_2, window_bounds = array<i64: 16, 1>}, {pipeline_mode = #tpu.pipeline_mode<synchronous>, transform_indices = @transform_3, window_bounds = array<i64: 16, 1>}, {pipeline_mode = #tpu.pipeline_mode<synchronous>, transform_indices = @transform_4, window_bounds = array<i64: 16, 1>}, {pipeline_mode = #tpu.pipeline_mode<synchronous>, transform_indices = @transform_5, window_bounds = array<i64: 16, 512>}]} {
    %c0 = arith.constant 0 : index
    %c0_0 = arith.constant 0 : index
    %0 = vector.load %arg1[%c0, %c0_0] : memref<72x512xbf16, #tpu.memory_space<vmem>>, vector<72x512xbf16>
    %1 = arith.extf %0 : vector<72x512xbf16> to vector<72x512xf32>
    %c0_1 = arith.constant 0 : index
    %c0_2 = arith.constant 0 : index
    %2 = vector.load %arg2[%c0_1, %c0_2] : memref<16x72xf32, #tpu.memory_space<vmem>>, vector<16x72xf32>
    %cst = arith.constant dense<0.000000e+00> : vector<16x512xf32>
    %3 = tpu.matmul %2, %1, %cst {dimension_numbers = #tpu.dot_dimension_numbers<[1], [0], [0], [1], [0, 0, 1, 1], [], []>} : vector<16x72xf32>, vector<72x512xf32>, vector<16x512xf32> -> vector<16x512xf32>
    %c0_3 = arith.constant 0 : index
    %c0_4 = arith.constant 0 : index
    %4 = vector.load %arg3[%c0_3, %c0_4] : memref<16x1xf32, #tpu.memory_space<vmem>>, vector<16x1xf32>
    %5 = vector.broadcast %4 : vector<16x1xf32> to vector<16x512xf32>
    %6 = arith.addf %3, %5 : vector<16x512xf32>
    %cst_5 = arith.constant dense<0.000000e+00> : vector<16xf32>
    %7 = vector.multi_reduction <add>, %6, %cst_5 [1] : vector<16x512xf32> to vector<16xf32>
    %8 = vector.shape_cast %7 : vector<16xf32> to vector<16x1xf32>
    %cst_6 = arith.constant 5.120000e+02 : f32
    %9 = vector.broadcast %cst_6 : f32 to vector<16x1xf32>
    %10 = arith.divf %8, %9 : vector<16x1xf32>
    %11 = vector.broadcast %10 : vector<16x1xf32> to vector<16x512xf32>
    %12 = arith.subf %6, %11 : vector<16x512xf32>
    %13 = arith.mulf %12, %12 : vector<16x512xf32>
    %cst_7 = arith.constant dense<0.000000e+00> : vector<16xf32>
    %14 = vector.multi_reduction <add>, %13, %cst_7 [1] : vector<16x512xf32> to vector<16xf32>
    %15 = vector.shape_cast %14 : vector<16xf32> to vector<16x1xf32>
    %cst_8 = arith.constant 5.120000e+02 : f32
    %16 = vector.broadcast %cst_8 : f32 to vector<16x1xf32>
    %17 = arith.divf %15, %16 : vector<16x1xf32>
    %cst_9 = arith.constant 9.99999974E-6 : f32
    %18 = vector.broadcast %cst_9 : f32 to vector<16x1xf32>
    %19 = arith.addf %17, %18 : vector<16x1xf32>
    %20 = math.rsqrt %19 : vector<16x1xf32>
    %21 = vector.broadcast %20 : vector<16x1xf32> to vector<16x512xf32>
    %22 = arith.mulf %12, %21 : vector<16x512xf32>
    %c0_10 = arith.constant 0 : index
    %c0_11 = arith.constant 0 : index
    %23 = vector.load %arg4[%c0_10, %c0_11] : memref<16x1xf32, #tpu.memory_space<vmem>>, vector<16x1xf32>
    %24 = vector.broadcast %23 : vector<16x1xf32> to vector<16x512xf32>
    %25 = arith.mulf %22, %24 : vector<16x512xf32>
    %c0_12 = arith.constant 0 : index
    %c0_13 = arith.constant 0 : index
    %26 = vector.load %arg5[%c0_12, %c0_13] : memref<16x1xf32, #tpu.memory_space<vmem>>, vector<16x1xf32>
    %27 = vector.broadcast %26 : vector<16x1xf32> to vector<16x512xf32>
    %28 = arith.addf %25, %27 : vector<16x512xf32>
    %cst_14 = arith.constant 0.000000e+00 : f32
    %29 = vector.broadcast %cst_14 : f32 to vector<16x512xf32>
    %30 = arith.cmpf oge, %28, %29 : vector<16x512xf32>
    %cst_15 = arith.constant 2.000000e-01 : f32
    %31 = vector.broadcast %cst_15 : f32 to vector<16x512xf32>
    %32 = arith.mulf %31, %28 : vector<16x512xf32>
    %33 = arith.select %30, %28, %32 : vector<16x512xi1>, vector<16x512xf32>
    %34 = arith.truncf %33 : vector<16x512xf32> to vector<16x512xbf16>
    %c0_16 = arith.constant 0 : index
    %c0_17 = arith.constant 0 : index
    %35 = vector.load %arg6[%c0_16, %c0_17] : memref<16x512xbf16, #tpu.memory_space<vmem>>, vector<16x512xbf16>
    tpu.vector_store %arg6[%c0_16, %c0_17], %34 {strides = array<i32>} : memref<16x512xbf16, #tpu.memory_space<vmem>>, vector<16x512xbf16>,
    return
  }
  func.func @transform_0(%arg0: i32) -> (i32, i32) {
    %c0_i32 = arith.constant 0 : i32
    %c0_i32_0 = arith.constant 0 : i32
    %c0_i32_1 = arith.constant 0 : i32
    return %c0_i32, %c0_i32_0 : i32, i32
  }
  func.func @transform_1(%arg0: i32) -> (i32, i32) {
    %c0_i32 = arith.constant 0 : i32
    %c0_i32_0 = arith.constant 0 : i32
    %c0_i32_1 = arith.constant 0 : i32
    return %c0_i32, %c0_i32_0 : i32, i32
  }
  func.func @transform_2(%arg0: i32) -> (i32, i32) {
    %c0_i32 = arith.constant 0 : i32
    %c0_i32_0 = arith.constant 0 : i32
    %c0_i32_1 = arith.constant 0 : i32
    return %c0_i32, %c0_i32_0 : i32, i32
  }
  func.func @transform_3(%arg0: i32) -> (i32, i32) {
    %c0_i32 = arith.constant 0 : i32
    %c0_i32_0 = arith.constant 0 : i32
    %c0_i32_1 = arith.constant 0 : i32
    return %c0_i32, %c0_i32_0 : i32, i32
  }
  func.func @transform_4(%arg0: i32) -> (i32, i32) {
    %c0_i32 = arith.constant 0 : i32
    %c0_i32_0 = arith.constant 0 : i32
    %c0_i32_1 = arith.constant 0 : i32
    return %c0_i32, %c0_i32_0 : i32, i32
  }
  func.func @transform_5(%arg0: i32) -> (i32, i32) {
    %c0_i32 = arith.constant 0 : i32
    %c0_i32_0 = arith.constant 0 : i32
    %c0_i32_1 = arith.constant 0 : i32
    return %c0_i32, %c0_i32_0 : i32, i32
  }
}

module attributes {stable_mosaic.version = 11 : i64} {
  func.func @_conv_bn_lrelu_kernel(%arg0: i32, %arg1: memref<144x128xbf16, #tpu.memory_space<vmem>>, %arg2: memref<32x144xf32, #tpu.memory_space<vmem>>, %arg3: memref<32x1xf32, #tpu.memory_space<vmem>>, %arg4: memref<32x1xf32, #tpu.memory_space<vmem>>, %arg5: memref<32x1xf32, #tpu.memory_space<vmem>>, %arg6: memref<32x128xbf16, #tpu.memory_space<vmem>>) attributes {dimension_semantics = [#tpu.dimension_semantics<arbitrary>], iteration_bounds = array<i64: 1>, scalar_prefetch = 0 : i64, scratch_operands = 0 : i64, tpu.core_type = #tpu.core_type<tc>, window_params = [{pipeline_mode = #tpu.pipeline_mode<synchronous>, transform_indices = @transform_0, window_bounds = array<i64: 144, 128>}, {pipeline_mode = #tpu.pipeline_mode<synchronous>, transform_indices = @transform_1, window_bounds = array<i64: 32, 144>}, {pipeline_mode = #tpu.pipeline_mode<synchronous>, transform_indices = @transform_2, window_bounds = array<i64: 32, 1>}, {pipeline_mode = #tpu.pipeline_mode<synchronous>, transform_indices = @transform_3, window_bounds = array<i64: 32, 1>}, {pipeline_mode = #tpu.pipeline_mode<synchronous>, transform_indices = @transform_4, window_bounds = array<i64: 32, 1>}, {pipeline_mode = #tpu.pipeline_mode<synchronous>, transform_indices = @transform_5, window_bounds = array<i64: 32, 128>}]} {
    %c0 = arith.constant 0 : index
    %c0_0 = arith.constant 0 : index
    %0 = vector.load %arg1[%c0, %c0_0] : memref<144x128xbf16, #tpu.memory_space<vmem>>, vector<144x128xbf16>
    %1 = arith.extf %0 : vector<144x128xbf16> to vector<144x128xf32>
    %c0_1 = arith.constant 0 : index
    %c0_2 = arith.constant 0 : index
    %2 = vector.load %arg2[%c0_1, %c0_2] : memref<32x144xf32, #tpu.memory_space<vmem>>, vector<32x144xf32>
    %cst = arith.constant dense<0.000000e+00> : vector<32x128xf32>
    %3 = tpu.matmul %2, %1, %cst {dimension_numbers = #tpu.dot_dimension_numbers<[1], [0], [0], [1], [0, 0, 1, 1], [], []>} : vector<32x144xf32>, vector<144x128xf32>, vector<32x128xf32> -> vector<32x128xf32>
    %c0_3 = arith.constant 0 : index
    %c0_4 = arith.constant 0 : index
    %4 = vector.load %arg3[%c0_3, %c0_4] : memref<32x1xf32, #tpu.memory_space<vmem>>, vector<32x1xf32>
    %5 = vector.broadcast %4 : vector<32x1xf32> to vector<32x128xf32>
    %6 = arith.addf %3, %5 : vector<32x128xf32>
    %cst_5 = arith.constant dense<0.000000e+00> : vector<32xf32>
    %7 = vector.multi_reduction <add>, %6, %cst_5 [1] : vector<32x128xf32> to vector<32xf32>
    %8 = vector.shape_cast %7 : vector<32xf32> to vector<32x1xf32>
    %cst_6 = arith.constant 1.280000e+02 : f32
    %9 = vector.broadcast %cst_6 : f32 to vector<32x1xf32>
    %10 = arith.divf %8, %9 : vector<32x1xf32>
    %11 = vector.broadcast %10 : vector<32x1xf32> to vector<32x128xf32>
    %12 = arith.subf %6, %11 : vector<32x128xf32>
    %13 = arith.mulf %12, %12 : vector<32x128xf32>
    %cst_7 = arith.constant dense<0.000000e+00> : vector<32xf32>
    %14 = vector.multi_reduction <add>, %13, %cst_7 [1] : vector<32x128xf32> to vector<32xf32>
    %15 = vector.shape_cast %14 : vector<32xf32> to vector<32x1xf32>
    %cst_8 = arith.constant 1.280000e+02 : f32
    %16 = vector.broadcast %cst_8 : f32 to vector<32x1xf32>
    %17 = arith.divf %15, %16 : vector<32x1xf32>
    %cst_9 = arith.constant 9.99999974E-6 : f32
    %18 = vector.broadcast %cst_9 : f32 to vector<32x1xf32>
    %19 = arith.addf %17, %18 : vector<32x1xf32>
    %20 = math.rsqrt %19 : vector<32x1xf32>
    %21 = vector.broadcast %20 : vector<32x1xf32> to vector<32x128xf32>
    %22 = arith.mulf %12, %21 : vector<32x128xf32>
    %c0_10 = arith.constant 0 : index
    %c0_11 = arith.constant 0 : index
    %23 = vector.load %arg4[%c0_10, %c0_11] : memref<32x1xf32, #tpu.memory_space<vmem>>, vector<32x1xf32>
    %24 = vector.broadcast %23 : vector<32x1xf32> to vector<32x128xf32>
    %25 = arith.mulf %22, %24 : vector<32x128xf32>
    %c0_12 = arith.constant 0 : index
    %c0_13 = arith.constant 0 : index
    %26 = vector.load %arg5[%c0_12, %c0_13] : memref<32x1xf32, #tpu.memory_space<vmem>>, vector<32x1xf32>
    %27 = vector.broadcast %26 : vector<32x1xf32> to vector<32x128xf32>
    %28 = arith.addf %25, %27 : vector<32x128xf32>
    %cst_14 = arith.constant 0.000000e+00 : f32
    %29 = vector.broadcast %cst_14 : f32 to vector<32x128xf32>
    %30 = arith.cmpf oge, %28, %29 : vector<32x128xf32>
    %cst_15 = arith.constant 2.000000e-01 : f32
    %31 = vector.broadcast %cst_15 : f32 to vector<32x128xf32>
    %32 = arith.mulf %31, %28 : vector<32x128xf32>
    %33 = arith.select %30, %28, %32 : vector<32x128xi1>, vector<32x128xf32>
    %34 = arith.truncf %33 : vector<32x128xf32> to vector<32x128xbf16>
    %c0_16 = arith.constant 0 : index
    %c0_17 = arith.constant 0 : index
    %35 = vector.load %arg6[%c0_16, %c0_17] : memref<32x128xbf16, #tpu.memory_space<vmem>>, vector<32x128xbf16>
    tpu.vector_store %arg6[%c0_16, %c0_17], %34 {strides = array<i32>} : memref<32x128xbf16, #tpu.memory_space<vmem>>, vector<32x128xbf16>,
    return
  }
  func.func @transform_0(%arg0: i32) -> (i32, i32) {
    %c0_i32 = arith.constant 0 : i32
    %c0_i32_0 = arith.constant 0 : i32
    %c0_i32_1 = arith.constant 0 : i32
    return %c0_i32, %c0_i32_0 : i32, i32
  }
  func.func @transform_1(%arg0: i32) -> (i32, i32) {
    %c0_i32 = arith.constant 0 : i32
    %c0_i32_0 = arith.constant 0 : i32
    %c0_i32_1 = arith.constant 0 : i32
    return %c0_i32, %c0_i32_0 : i32, i32
  }
  func.func @transform_2(%arg0: i32) -> (i32, i32) {
    %c0_i32 = arith.constant 0 : i32
    %c0_i32_0 = arith.constant 0 : i32
    %c0_i32_1 = arith.constant 0 : i32
    return %c0_i32, %c0_i32_0 : i32, i32
  }
  func.func @transform_3(%arg0: i32) -> (i32, i32) {
    %c0_i32 = arith.constant 0 : i32
    %c0_i32_0 = arith.constant 0 : i32
    %c0_i32_1 = arith.constant 0 : i32
    return %c0_i32, %c0_i32_0 : i32, i32
  }
  func.func @transform_4(%arg0: i32) -> (i32, i32) {
    %c0_i32 = arith.constant 0 : i32
    %c0_i32_0 = arith.constant 0 : i32
    %c0_i32_1 = arith.constant 0 : i32
    return %c0_i32, %c0_i32_0 : i32, i32
  }
  func.func @transform_5(%arg0: i32) -> (i32, i32) {
    %c0_i32 = arith.constant 0 : i32
    %c0_i32_0 = arith.constant 0 : i32
    %c0_i32_1 = arith.constant 0 : i32
    return %c0_i32, %c0_i32_0 : i32, i32
  }
}

module attributes {stable_mosaic.version = 11 : i64} {
  func.func @_conv_bn_lrelu_kernel(%arg0: i32, %arg1: memref<288x128xbf16, #tpu.memory_space<vmem>>, %arg2: memref<32x288xf32, #tpu.memory_space<vmem>>, %arg3: memref<32x1xf32, #tpu.memory_space<vmem>>, %arg4: memref<32x1xf32, #tpu.memory_space<vmem>>, %arg5: memref<32x1xf32, #tpu.memory_space<vmem>>, %arg6: memref<32x128xbf16, #tpu.memory_space<vmem>>) attributes {dimension_semantics = [#tpu.dimension_semantics<arbitrary>], iteration_bounds = array<i64: 1>, scalar_prefetch = 0 : i64, scratch_operands = 0 : i64, tpu.core_type = #tpu.core_type<tc>, window_params = [{pipeline_mode = #tpu.pipeline_mode<synchronous>, transform_indices = @transform_0, window_bounds = array<i64: 288, 128>}, {pipeline_mode = #tpu.pipeline_mode<synchronous>, transform_indices = @transform_1, window_bounds = array<i64: 32, 288>}, {pipeline_mode = #tpu.pipeline_mode<synchronous>, transform_indices = @transform_2, window_bounds = array<i64: 32, 1>}, {pipeline_mode = #tpu.pipeline_mode<synchronous>, transform_indices = @transform_3, window_bounds = array<i64: 32, 1>}, {pipeline_mode = #tpu.pipeline_mode<synchronous>, transform_indices = @transform_4, window_bounds = array<i64: 32, 1>}, {pipeline_mode = #tpu.pipeline_mode<synchronous>, transform_indices = @transform_5, window_bounds = array<i64: 32, 128>}]} {
    %c0 = arith.constant 0 : index
    %c0_0 = arith.constant 0 : index
    %0 = vector.load %arg1[%c0, %c0_0] : memref<288x128xbf16, #tpu.memory_space<vmem>>, vector<288x128xbf16>
    %1 = arith.extf %0 : vector<288x128xbf16> to vector<288x128xf32>
    %c0_1 = arith.constant 0 : index
    %c0_2 = arith.constant 0 : index
    %2 = vector.load %arg2[%c0_1, %c0_2] : memref<32x288xf32, #tpu.memory_space<vmem>>, vector<32x288xf32>
    %cst = arith.constant dense<0.000000e+00> : vector<32x128xf32>
    %3 = tpu.matmul %2, %1, %cst {dimension_numbers = #tpu.dot_dimension_numbers<[1], [0], [0], [1], [0, 0, 1, 1], [], []>} : vector<32x288xf32>, vector<288x128xf32>, vector<32x128xf32> -> vector<32x128xf32>
    %c0_3 = arith.constant 0 : index
    %c0_4 = arith.constant 0 : index
    %4 = vector.load %arg3[%c0_3, %c0_4] : memref<32x1xf32, #tpu.memory_space<vmem>>, vector<32x1xf32>
    %5 = vector.broadcast %4 : vector<32x1xf32> to vector<32x128xf32>
    %6 = arith.addf %3, %5 : vector<32x128xf32>
    %7 = tpu.iota {dimensions = array<i32: 1>} : vector<32x128xi32>
    %c32_i32 = arith.constant 32 : i32
    %8 = vector.broadcast %c32_i32 : i32 to vector<32x128xi32>
    %9 = arith.cmpi slt, %7, %8 : vector<32x128xi32>
    %cst_5 = arith.constant 0.000000e+00 : f32
    %10 = vector.broadcast %cst_5 : f32 to vector<32x128xf32>
    %11 = arith.select %9, %6, %10 : vector<32x128xi1>, vector<32x128xf32>
    %cst_6 = arith.constant dense<0.000000e+00> : vector<32xf32>
    %12 = vector.multi_reduction <add>, %11, %cst_6 [1] : vector<32x128xf32> to vector<32xf32>
    %13 = vector.shape_cast %12 : vector<32xf32> to vector<32x1xf32>
    %cst_7 = arith.constant 3.125000e-02 : f32
    %14 = vector.broadcast %cst_7 : f32 to vector<32x1xf32>
    %15 = arith.mulf %13, %14 : vector<32x1xf32>
    %16 = vector.broadcast %15 : vector<32x1xf32> to vector<32x128xf32>
    %17 = arith.subf %6, %16 : vector<32x128xf32>
    %18 = arith.mulf %17, %17 : vector<32x128xf32>
    %cst_8 = arith.constant 0.000000e+00 : f32
    %19 = vector.broadcast %cst_8 : f32 to vector<32x128xf32>
    %20 = arith.select %9, %18, %19 : vector<32x128xi1>, vector<32x128xf32>
    %cst_9 = arith.constant dense<0.000000e+00> : vector<32xf32>
    %21 = vector.multi_reduction <add>, %20, %cst_9 [1] : vector<32x128xf32> to vector<32xf32>
    %22 = vector.shape_cast %21 : vector<32xf32> to vector<32x1xf32>
    %cst_10 = arith.constant 3.125000e-02 : f32
    %23 = vector.broadcast %cst_10 : f32 to vector<32x1xf32>
    %24 = arith.mulf %22, %23 : vector<32x1xf32>
    %cst_11 = arith.constant 9.99999974E-6 : f32
    %25 = vector.broadcast %cst_11 : f32 to vector<32x1xf32>
    %26 = arith.addf %24, %25 : vector<32x1xf32>
    %27 = math.rsqrt %26 : vector<32x1xf32>
    %28 = vector.broadcast %27 : vector<32x1xf32> to vector<32x128xf32>
    %29 = arith.mulf %17, %28 : vector<32x128xf32>
    %c0_12 = arith.constant 0 : index
    %c0_13 = arith.constant 0 : index
    %30 = vector.load %arg4[%c0_12, %c0_13] : memref<32x1xf32, #tpu.memory_space<vmem>>, vector<32x1xf32>
    %31 = vector.broadcast %30 : vector<32x1xf32> to vector<32x128xf32>
    %32 = arith.mulf %29, %31 : vector<32x128xf32>
    %c0_14 = arith.constant 0 : index
    %c0_15 = arith.constant 0 : index
    %33 = vector.load %arg5[%c0_14, %c0_15] : memref<32x1xf32, #tpu.memory_space<vmem>>, vector<32x1xf32>
    %34 = vector.broadcast %33 : vector<32x1xf32> to vector<32x128xf32>
    %35 = arith.addf %32, %34 : vector<32x128xf32>
    %cst_16 = arith.constant 0.000000e+00 : f32
    %36 = vector.broadcast %cst_16 : f32 to vector<32x128xf32>
    %37 = arith.cmpf oge, %35, %36 : vector<32x128xf32>
    %cst_17 = arith.constant 2.000000e-01 : f32
    %38 = vector.broadcast %cst_17 : f32 to vector<32x128xf32>
    %39 = arith.mulf %38, %35 : vector<32x128xf32>
    %40 = arith.select %37, %35, %39 : vector<32x128xi1>, vector<32x128xf32>
    %41 = arith.truncf %40 : vector<32x128xf32> to vector<32x128xbf16>
    %c0_18 = arith.constant 0 : index
    %c0_19 = arith.constant 0 : index
    %42 = vector.load %arg6[%c0_18, %c0_19] : memref<32x128xbf16, #tpu.memory_space<vmem>>, vector<32x128xbf16>
    tpu.vector_store %arg6[%c0_18, %c0_19], %41 {strides = array<i32>} : memref<32x128xbf16, #tpu.memory_space<vmem>>, vector<32x128xbf16>,
    return
  }
  func.func @transform_0(%arg0: i32) -> (i32, i32) {
    %c0_i32 = arith.constant 0 : i32
    %c0_i32_0 = arith.constant 0 : i32
    %c0_i32_1 = arith.constant 0 : i32
    return %c0_i32, %c0_i32_0 : i32, i32
  }
  func.func @transform_1(%arg0: i32) -> (i32, i32) {
    %c0_i32 = arith.constant 0 : i32
    %c0_i32_0 = arith.constant 0 : i32
    %c0_i32_1 = arith.constant 0 : i32
    return %c0_i32, %c0_i32_0 : i32, i32
  }
  func.func @transform_2(%arg0: i32) -> (i32, i32) {
    %c0_i32 = arith.constant 0 : i32
    %c0_i32_0 = arith.constant 0 : i32
    %c0_i32_1 = arith.constant 0 : i32
    return %c0_i32, %c0_i32_0 : i32, i32
  }
  func.func @transform_3(%arg0: i32) -> (i32, i32) {
    %c0_i32 = arith.constant 0 : i32
    %c0_i32_0 = arith.constant 0 : i32
    %c0_i32_1 = arith.constant 0 : i32
    return %c0_i32, %c0_i32_0 : i32, i32
  }
  func.func @transform_4(%arg0: i32) -> (i32, i32) {
    %c0_i32 = arith.constant 0 : i32
    %c0_i32_0 = arith.constant 0 : i32
    %c0_i32_1 = arith.constant 0 : i32
    return %c0_i32, %c0_i32_0 : i32, i32
  }
  func.func @transform_5(%arg0: i32) -> (i32, i32) {
    %c0_i32 = arith.constant 0 : i32
    %c0_i32_0 = arith.constant 0 : i32
    %c0_i32_1 = arith.constant 0 : i32
    return %c0_i32, %c0_i32_0 : i32, i32
  }
}

module attributes {stable_mosaic.version = 11 : i64} {
  func.func @_conv_kernel(%arg0: i32, %arg1: memref<512x128xbf16, #tpu.memory_space<vmem>>, %arg2: memref<1x512xf32, #tpu.memory_space<vmem>>, %arg3: memref<1x1xf32, #tpu.memory_space<vmem>>, %arg4: memref<1x128xf32, #tpu.memory_space<vmem>>) attributes {dimension_semantics = [#tpu.dimension_semantics<parallel>], iteration_bounds = array<i64: 1>, scalar_prefetch = 0 : i64, scratch_operands = 0 : i64, tpu.core_type = #tpu.core_type<tc>, window_params = [{transform_indices = @transform_0, window_bounds = array<i64: 512, 128>}, {pipeline_mode = #tpu.pipeline_mode<synchronous>, transform_indices = @transform_1, window_bounds = array<i64: 1, 512>}, {pipeline_mode = #tpu.pipeline_mode<synchronous>, transform_indices = @transform_2, window_bounds = array<i64: 1, 1>}, {transform_indices = @transform_3, window_bounds = array<i64: 1, 128>}]} {
    %c0 = arith.constant 0 : index
    %c0_0 = arith.constant 0 : index
    %0 = vector.load %arg1[%c0, %c0_0] : memref<512x128xbf16, #tpu.memory_space<vmem>>, vector<512x128xbf16>
    %1 = arith.extf %0 : vector<512x128xbf16> to vector<512x128xf32>
    %c0_1 = arith.constant 0 : index
    %c0_2 = arith.constant 0 : index
    %2 = vector.load %arg2[%c0_1, %c0_2] : memref<1x512xf32, #tpu.memory_space<vmem>>, vector<1x512xf32>
    %cst = arith.constant dense<0.000000e+00> : vector<1x128xf32>
    %3 = tpu.matmul %2, %1, %cst {dimension_numbers = #tpu.dot_dimension_numbers<[1], [0], [0], [1], [0, 0, 1, 1], [], []>} : vector<1x512xf32>, vector<512x128xf32>, vector<1x128xf32> -> vector<1x128xf32>
    %c0_3 = arith.constant 0 : index
    %c0_4 = arith.constant 0 : index
    %4 = vector.load %arg3[%c0_3, %c0_4] : memref<1x1xf32, #tpu.memory_space<vmem>>, vector<1x1xf32>
    %5 = vector.broadcast %4 : vector<1x1xf32> to vector<1x128xf32>
    %6 = arith.addf %3, %5 : vector<1x128xf32>
    %c0_5 = arith.constant 0 : index
    %c0_6 = arith.constant 0 : index
    %7 = vector.load %arg4[%c0_5, %c0_6] : memref<1x128xf32, #tpu.memory_space<vmem>>, vector<1x128xf32>
    tpu.vector_store %arg4[%c0_5, %c0_6], %6 {strides = array<i32>} : memref<1x128xf32, #tpu.memory_space<vmem>>, vector<1x128xf32>,
    return
  }
  func.func @transform_0(%arg0: i32) -> (i32, i32) {
    %c0_i32 = arith.constant 0 : i32
    %c0_i32_0 = arith.constant 0 : i32
    return %c0_i32, %arg0 : i32, i32
  }
  func.func @transform_1(%arg0: i32) -> (i32, i32) {
    %c0_i32 = arith.constant 0 : i32
    %c0_i32_0 = arith.constant 0 : i32
    %c0_i32_1 = arith.constant 0 : i32
    return %c0_i32, %c0_i32_0 : i32, i32
  }
  func.func @transform_2(%arg0: i32) -> (i32, i32) {
    %c0_i32 = arith.constant 0 : i32
    %c0_i32_0 = arith.constant 0 : i32
    %c0_i32_1 = arith.constant 0 : i32
    return %c0_i32, %c0_i32_0 : i32, i32
  }
  func.func @transform_3(%arg0: i32) -> (i32, i32) {
    %c0_i32 = arith.constant 0 : i32
    %c0_i32_0 = arith.constant 0 : i32
    return %c0_i32, %arg0 : i32, i32
  }
}

</mosaic_0001>

<bundles_post_ra>
// kernel: discriminator_edges_forward.5
= control target key start
LH: loop header
LB: loop body
LE: loop exit
PB: predicated region body
PF: predicated region fallthrough
CT: control target
= control target key end

     0   :  { %s682_s12 = smov 0   ;;  %s684_s13 = smov 0   ;;  %s838_s0 = inlined_call_operand.vmem [shape: bf16[36,2048], index: 0, kind: input, shape index: {}]   ;;  %s839_s1 = inlined_call_operand.vmem [shape: f32[8,36], index: 1, kind: input, shape index: {}]   ;;  %s840_s2 = inlined_call_operand.vmem [shape: f32[8,1], index: 2, kind: input, shape index: {}]   ;;  %s841_s3 = inlined_call_operand.vmem [shape: bf16[8,2048], index: 3, kind: output, shape index: {}]  }
   0x1   :  { %s686_s14 = smov 0  }
   0x2 LB: > { %s581_s15 = sadd.s32 4294967295, %s659_s14   ;;  %s699_s16 = sadd.s32 1, %s659_s14   ;;  %s659_s14 = sphi %s686_s14, %s844_s14   ;;  %s655_s13 = sphi %s684_s13, %s843_s13   ;;  %s651_s12 = sphi %s682_s12, %s842_s12  }
   0x3   : > { %s17_s17 = ssub.s32 %s659_s14, %s699_s16  ;;  %s20_s18 = sadd.s32 1, %s655_s13 }
   0x4   : > { %p18_p0 = scmp.eq.s32.totalorder %s17_s17, 0  ;;  %p27_p1 = scmp.ne.s32.totalorder %s655_s13, %s651_s12 }
   0x5   : > { %p28_p2 = scmp.eq.s32.totalorder %s659_s14, 0  ;;  %p584_p4 = scmp.ge.s32.totalorder %s659_s14, 2 }
   0x6   : > { %s708_s19 = scalar_select %p18_p0, %s655_s13, %s20_s18  }
   0x7   : > { %p29_p3 = por %p28_p2, %p27_p1  ;;  %127 = sbr.rel (%p584_p4) target bundleno = 36 (0x24), region = 24 }
   0xc   : > { %130 = sbr.rel (!%p29_p3) target bundleno = 36 (0x24), region = 28  ;;  %s132_s20 = sand.u32 (%p29_p3), 1, %s655_s13  }
   0xd   : > { %s608_s21 = sshll.u32 (%p29_p3), %s659_s14, 5  ;;  %s609_s22 = smul.u32 (%p29_p3), 160, %s132_s20 }
   0xe   : > { %s716_s25 = scalar_lea.vmem (%p29_p3), %s838_s0, %s608_s21 }
   0xf   : > { %v150_v0 = vld [vmem:[%s716_s25] sm:$0xff] (%p29_p3)  ;;  %v152_v1 = vld [vmem:[%s716_s25 + $0x8] sm:$0xff] (%p29_p3)  ;;  %v154_v2 = vld [vmem:[%s716_s25 + $0x10] sm:$0xff] (%p29_p3)  ;;  %s721_s26 = scalar_lea.vmem (%p29_p3), [#allocation2], %s609_s22 }
  0x10   : > { %151 = vst [vmem:[%s721_s26] sm:$0xff] (%p29_p3), %v150_v0  ;;  %v156_v3 = vld [vmem:[%s716_s25 + $0x18] sm:$0xff] (%p29_p3)  ;;  %v158_v4 = vld [vmem:[%s716_s25 + $0x40] sm:$0xff] (%p29_p3)  ;;  %v160_v5 = vld [vmem:[%s716_s25 + $0x48] sm:$0xff] (%p29_p3) }
  0x11   : > { %153 = vst [vmem:[%s721_s26 + $0x8] sm:$0xff] %v152_v1  ;;  %v162_v6 = vld [vmem:[%s716_s25 + $0x50] sm:$0xff]  ;;  %v164_v7 = vld [vmem:[%s716_s25 + $0x58] sm:$0xff]  ;;  %v166_v8 = vld [vmem:[%s716_s25 + $0x80] sm:$0xff] }
  0x12   : > { %155 = vst [vmem:[%s721_s26 + $0x10] sm:$0xff] %v154_v2  ;;  %v168_v9 = vld [vmem:[%s716_s25 + $0x88] sm:$0xff]  ;;  %v170_v10 = vld [vmem:[%s716_s25 + $0x90] sm:$0xff]  ;;  %v172_v11 = vld [vmem:[%s716_s25 + $0x98] sm:$0xff] }
  0x13   : > { %157 = vst [vmem:[%s721_s26 + $0x18] sm:$0xff] %v156_v3  ;;  %v174_v12 = vld [vmem:[%s716_s25 + $0xc0] sm:$0xff]  ;;  %v176_v13 = vld [vmem:[%s716_s25 + $0xc8] sm:$0xff]  ;;  %v178_v14 = vld [vmem:[%s716_s25 + $0xd0] sm:$0xff] }
  0x14   : > { %159 = vst [vmem:[%s721_s26 + $0x20] sm:$0xff] %v158_v4  ;;  %v180_v15 = vld [vmem:[%s716_s25 + $0xd8] sm:$0xff]  ;;  %v182_v16 = vld [vmem:[%s716_s25 + $0x100] sm:$0xff]  ;;  %v184_v17 = vld [vmem:[%s716_s25 + $0x108] sm:$0xff] }
  0x15   : > { %161 = vst [vmem:[%s721_s26 + $0x28] sm:$0xff] %v160_v5  ;;  %v186_v18 = vld [vmem:[%s716_s25 + $0x110] sm:$0xff]  ;;  %v188_v19 = vld [vmem:[%s716_s25 + $0x118] sm:$0xff] }
  0x16   : > { %163 = vst [vmem:[%s721_s26 + $0x30] sm:$0xff] %v162_v6 }
  0x17   : > { %165 = vst [vmem:[%s721_s26 + $0x38] sm:$0xff] %v164_v7 }
  0x18   : > { %167 = vst [vmem:[%s721_s26 + $0x40] sm:$0xff] %v166_v8 }
  0x19   : > { %169 = vst [vmem:[%s721_s26 + $0x48] sm:$0xff] %v168_v9 }
  0x1a   : > { %171 = vst [vmem:[%s721_s26 + $0x50] sm:$0xff] %v170_v10 }
  0x1b   : > { %173 = vst [vmem:[%s721_s26 + $0x58] sm:$0xff] %v172_v11 }
  0x1c   : > { %175 = vst [vmem:[%s721_s26 + $0x60] sm:$0xff] %v174_v12 }
  0x1d   : > { %177 = vst [vmem:[%s721_s26 + $0x68] sm:$0xff] %v176_v13 }
  0x1e   : > { %179 = vst [vmem:[%s721_s26 + $0x70] sm:$0xff] %v178_v14 }
  0x1f   : > { %181 = vst [vmem:[%s721_s26 + $0x78] sm:$0xff] %v180_v15 }
  0x20   : > { %183 = vst [vmem:[%s721_s26 + $0x80] sm:$0xff] %v182_v16 }
  0x21   : > { %185 = vst [vmem:[%s721_s26 + $0x88] sm:$0xff] %v184_v17 }
  0x22   : > { %187 = vst [vmem:[%s721_s26 + $0x90] sm:$0xff] %v186_v18 }
  0x23   : > { %189 = vst [vmem:[%s721_s26 + $0x98] sm:$0xff] %v188_v19 }
  0x24 PF: > { %p587_p5 = scmp.ge.s32.totalorder %s659_s14, 1  ;;  %p194_p6 = scmp.lt.s32.totalorder %s659_s14, 3 }
  0x26   : > { %p195_p7 = pnand %p587_p5, %p194_p6 }
  0x27   : > { %s201_s27 = sand.u32 (!%p195_p7), 1, %s651_s12   ;;  %s588_s7 = sshll.u32 (!%p195_p7), %s581_s15, 3 }
  0x28   : > { %198 = sbr.rel (%p195_p7) target bundleno = 210 (0xd2), region = 51  ;;  %p226_p8 = scmp.lt.s32.totalorder (!%p195_p7), %s588_s7, 15 }
  0x29   : > { %s610_s30 = smul.u32 (!%p195_p7), 160, %s201_s27 }
  0x2b   : > { %s766_s4 = scalar_lea.vmem (!%p195_p7), [#allocation2], %s610_s30 }
  0x2d   : > { %v292_v20 = vld [vmem:[%s840_s2] sm:$0xff]  ;;  %v661_v21 = vmov 0   ;;  %v248_v22 = vld [vmem:[%s766_s4 + $0x88] sm:$0x33]  ;;  %vm302_vm0 = vcmask 1043456   ;;  %v246_v51 = vld [vmem:[%s766_s4 + $0x78] sm:$0xff] }
  0x2e   : > { %636 = vset.pattern.permute.xlu0 %v661_v21  ;;  %v244_v23 = vld [vmem:[%s766_s4 + $0x68] sm:$0xff]  ;;  %v247_v24 = vld [vmem:[%s766_s4 + $0x80] sm:$0x33]  ;;  %v285_v25 = vunpack.c.l.bf16 %v248_v22  ;;  %v286_v26 = vunpack.c.h.bf16 %v248_v22  ;;  %v250_v45 = vld [vmem:[%s766_s4 + $0x98] sm:$0x33]  ;;  %vm298_vm1 = vcmask 293888   ;;  %v281_v59 = vunpack.c.l.bf16 %v246_v51 }
  0x2f   : > { %295 = vperm.xlu0 %636, %v292_v20   ;;  %v277_v27 = vunpack.c.l.bf16 %v244_v23  ;;  %v278_v28 = vunpack.c.h.bf16 %v244_v23  ;;  %v240_v29 = vld [vmem:[%s766_s4 + $0x48] sm:$0xff]  ;;  %v243_v30 = vld [vmem:[%s766_s4 + $0x60] sm:$0xff]  ;;  %v283_v31 = vunpack.c.l.bf16 %v247_v24  ;;  %v284_v32 = vunpack.c.h.bf16 %v247_v24  ;;  %v249_v55 = vld [vmem:[%s766_s4 + $0x90] sm:$0x33]  ;;  %s846_s7 = smov (!%p226_p8, %s588_s7), 15 }
  0x30   : > { %v236_v33 = vld [vmem:[%s766_s4 + $0x28] sm:$0xff]  ;;  %v239_v34 = vld [vmem:[%s766_s4 + $0x40] sm:$0xff]  ;;  %594 = vmatpush.msk.msra.mxu2 %vm302_vm0, %v285_v25  ;;  %596 = vmatpush.msk.msra.mxu3 %vm302_vm0, %v286_v26  ;;  %v269_v35 = vunpack.c.l.bf16 %v240_v29  ;;  %v270_v36 = vunpack.c.h.bf16 %v240_v29  ;;  %v275_v37 = vunpack.c.l.bf16 %v243_v30  ;;  %v276_v38 = vunpack.c.h.bf16 %v243_v30  ;;  %v242_v58 = vld [vmem:[%s766_s4 + $0x58] sm:$0xff]  ;;  %s589_s8 = sshll.u32 %s846_s7, 2 }
  0x31   : > { %v235_v39 = vld [vmem:[%s766_s4 + $0x20] sm:$0xff]  ;;  %590 = vmatpush.msk.msra.mxu0 %vm302_vm0, %v283_v31  ;;  %592 = vmatpush.msk.msra.mxu1 %vm302_vm0, %v284_v32  ;;  %v267_v40 = vunpack.c.l.bf16 %v239_v34  ;;  %v268_v41 = vunpack.c.h.bf16 %v239_v34  ;;  %v232_v42 = vld [vmem:[%s766_s4 + $0x8] sm:$0xff]  ;;  %v261_v43 = vunpack.c.l.bf16 %v236_v33  ;;  %v262_v44 = vunpack.c.h.bf16 %v236_v33  ;;  %v245_v63 = vld [vmem:[%s766_s4 + $0x70] sm:$0xff]  ;;  %s822_s11 = scalar_lea.vmem %s841_s3, %s589_s8 }
  0x32   : > { %379 = vmatpush.msra.mxu2 %v277_v27  ;;  %399 = vmatpush.msra.mxu3 %v278_v28  ;;  %v259_v46 = vunpack.c.l.bf16 %v235_v39  ;;  %v260_v47 = vunpack.c.h.bf16 %v235_v39  ;;  %v253_v48 = vunpack.c.l.bf16 %v232_v42  ;;  %v254_v49 = vunpack.c.h.bf16 %v232_v42  ;;  %v231_v50 = vld [vmem:[%s766_s4] sm:$0xff]  ;;  %v238_v2 = vld [vmem:[%s766_s4 + $0x38] sm:$0xff]  ;;  %v241_v3 = vld [vmem:[%s766_s4 + $0x50] sm:$0xff] }
  0x33   : > { %339 = vmatpush.msra.mxu0 %v275_v37  ;;  %359 = vmatpush.msra.mxu1 %v276_v38  ;;  %v787_v52 = vld [vmem:[%s839_s1] sm:$0xff]  ;;  %v289_v53 = vunpack.c.l.bf16 %v250_v45  ;;  %v290_v54 = vunpack.c.h.bf16 %v250_v45  ;;  %v251_v56 = vunpack.c.l.bf16 %v231_v50  ;;  %v252_v57 = vunpack.c.h.bf16 %v231_v50  ;;  %v234_v6 = vld [vmem:[%s766_s4 + $0x18] sm:$0xff]  ;;  %v237_v11 = vld [vmem:[%s766_s4 + $0x30] sm:$0xff] }
  0x34   : > { %380 = vmatpush.msra.mxu2 %v269_v35  ;;  %400 = vmatpush.msra.mxu3 %v270_v36  ;;  %v282_v60 = vunpack.c.h.bf16 %v246_v51  ;;  %v287_v61 = vunpack.c.l.bf16 %v249_v55  ;;  %v288_v62 = vunpack.c.h.bf16 %v249_v55  ;;  %v273_v0 = vunpack.c.l.bf16 %v242_v58  ;;  %v233_v14 = vld [vmem:[%s766_s4 + $0x10] sm:$0xff] }
  0x35   : > { %340 = vmatpush.msra.mxu0 %v267_v40  ;;  %360 = vmatpush.msra.mxu1 %v268_v41  ;;  %v274_v1 = vunpack.c.h.bf16 %v242_v58  ;;  %v279_v4 = vunpack.c.l.bf16 %v245_v63  ;;  %v280_v5 = vunpack.c.h.bf16 %v245_v63  ;;  %v265_v7 = vunpack.c.l.bf16 %v238_v2 }
  0x36   : > { %381 = vmatpush.msra.mxu2 %v261_v43  ;;  %401 = vmatpush.msra.mxu3 %v262_v44  ;;  %v266_v8 = vunpack.c.h.bf16 %v238_v2  ;;  %v271_v9 = vunpack.c.l.bf16 %v241_v3  ;;  %v272_v10 = vunpack.c.h.bf16 %v241_v3  ;;  %v257_v12 = vunpack.c.l.bf16 %v234_v6 }
  0x37   : > { %341 = vmatpush.msra.mxu0 %v259_v46  ;;  %361 = vmatpush.msra.mxu1 %v260_v47  ;;  %v258_v13 = vunpack.c.h.bf16 %v234_v6  ;;  %v263_v15 = vunpack.c.l.bf16 %v237_v11  ;;  %v264_v16 = vunpack.c.h.bf16 %v237_v11  ;;  %v255_v17 = vunpack.c.l.bf16 %v233_v14 }
  0x38   : > { %382 = vmatpush.msra.mxu2 %v253_v48  ;;  %402 = vmatpush.msra.mxu3 %v254_v49  ;;  %v256_v18 = vunpack.c.h.bf16 %v233_v14 }
  0x39   : > { %595 = vmatmul.msk.f32.vlgmr.msra.gmra.mxu2 %vm298_vm1, %v787_v52  ;;  %597 = vmatmul.msk.f32.vlgmr.msra.gmra.mxu3 %vm298_vm1, %v787_v52 }
  0x3a   : > { %602 = vmatpush.msk.msrb.mxu2 %vm302_vm0, %v289_v53  ;;  %604 = vmatpush.msk.msrb.mxu3 %vm302_vm0, %v290_v54 }
  0x3b   : > { %342 = vmatpush.msra.mxu0 %v251_v56  ;;  %362 = vmatpush.msra.mxu1 %v252_v57 }
  0x3c   : > { %459 = vmatpush.msrb.mxu2 %v281_v59  ;;  %479 = vmatpush.msrb.mxu3 %v282_v60 }
  0x3d   : > { %598 = vmatpush.msk.msrb.mxu0 %vm302_vm0, %v287_v61  ;;  %600 = vmatpush.msk.msrb.mxu1 %vm302_vm0, %v288_v62 }
  0x3e   : > { %460 = vmatpush.msrb.mxu2 %v273_v0  ;;  %480 = vmatpush.msrb.mxu3 %v274_v1 }
  0x3f   : > { %591 = vmatmul.msk.f32.vlgmr.msra.gmra.mxu0 %vm298_vm1, %v787_v52  ;;  %593 = vmatmul.msk.f32.vlgmr.msra.gmra.mxu1 %vm298_vm1, %v787_v52 }
  0x40   : > { %419 = vmatpush.msrb.mxu0 %v279_v4  ;;  %439 = vmatpush.msrb.mxu1 %v280_v5 }
  0x41   : > { %461 = vmatpush.msrb.mxu2 %v265_v7  ;;  %481 = vmatpush.msrb.mxu3 %v266_v8 }
  0x42   : > { %420 = vmatpush.msrb.mxu0 %v271_v9  ;;  %440 = vmatpush.msrb.mxu1 %v272_v10 }
  0x43   : > { %462 = vmatpush.msrb.mxu2 %v257_v12  ;;  %482 = vmatpush.msrb.mxu3 %v258_v13 }
  0x44   : > { %603 = vmatmul.msk.f32.vlgmr.msrb.gmra.mxu2 %vm298_vm1, %v787_v52  ;;  %605 = vmatmul.msk.f32.vlgmr.msrb.gmra.mxu3 %vm298_vm1, %v787_v52 }
  0x45   : > { %421 = vmatpush.msrb.mxu0 %v263_v15  ;;  %441 = vmatpush.msrb.mxu1 %v264_v16 }
  0x47   : > { %422 = vmatpush.msrb.mxu0 %v255_v17  ;;  %442 = vmatpush.msrb.mxu1 %v256_v18 }
  0x48   : > { %599 = vmatmul.msk.f32.vlgmr.msrb.gmra.mxu0 %vm298_vm1, %v787_v52  ;;  %601 = vmatmul.msk.f32.vlgmr.msrb.gmra.mxu1 %vm298_vm1, %v787_v52 }
  0xa1   : > { %v296_v19 = vpop.permute.xlu0 %295 }
  0xbc   : > { %v344_v20 = vpop.f32.mrf.mxu0  ;;  %v364_v21 = vpop.f32.mrf.mxu1 }
  0xbd   : > { %v345_v22 = vadd.f32 %v344_v20, %v296_v19  ;;  %v365_v23 = vadd.f32 %v364_v21, %v296_v19  ;;  %v384_v24 = vpop.f32.mrf.mxu2  ;;  %v404_v25 = vpop.f32.mrf.mxu3 }
  0xbe   : > { %v385_v26 = vadd.f32 %v384_v24, %v296_v19  ;;  %v405_v27 = vadd.f32 %v404_v25, %v296_v19 }
  0xbf   : > { %vm487_vm2 = vcmp.ge.f32.partialorder %v345_v22, 0.0  ;;  %v495_v28 = vmul.f32 0.2, %v345_v22  ;;  %vm488_vm3 = vcmp.ge.f32.partialorder %v365_v23, 0.0  ;;  %v496_v29 = vmul.f32 0.2, %v365_v23 }
  0xc0   : > { %vm489_vm4 = vcmp.ge.f32.partialorder %v385_v26, 0.0  ;;  %v497_v30 = vmul.f32 0.2, %v385_v26  ;;  %vm490_vm5 = vcmp.ge.f32.partialorder %v405_v27, 0.0  ;;  %v498_v31 = vmul.f32 0.2, %v405_v27 }
  0xc1   : > { %v503_v32 = vsel %vm487_vm2, %v345_v22, %v495_v28  ;;  %v504_v33 = vsel %vm488_vm3, %v365_v23, %v496_v29 }
  0xc2   : > { %v511_v34 = vpack.c.bf16 %v504_v33, %v503_v32  ;;  %v505_v35 = vsel %vm489_vm4, %v385_v26, %v497_v30  ;;  %v506_v36 = vsel %vm490_vm5, %v405_v27, %v498_v31 }
  0xc3   : > { %v512_v37 = vpack.c.bf16 %v506_v36, %v505_v35 }
  0xc4   : > { %515 = vst [vmem:[%s822_s11] sm:$0xff] %v511_v34 }
  0xc5   : > { %516 = vst [vmem:[%s822_s11 + $0x8] sm:$0xff] %v512_v37  ;;  %v424_v38 = vpop.f32.mrf.mxu0  ;;  %v444_v39 = vpop.f32.mrf.mxu1 }
  0xc6   : > { %v425_v40 = vadd.f32 %v424_v38, %v296_v19  ;;  %v445_v41 = vadd.f32 %v444_v39, %v296_v19 }
  0xc7   : > { %v464_v42 = vpop.f32.mrf.mxu2  ;;  %v484_v43 = vpop.f32.mrf.mxu3 }
  0xc8   : > { %vm491_vm6 = vcmp.ge.f32.partialorder %v425_v40, 0.0  ;;  %v499_v44 = vmul.f32 0.2, %v425_v40  ;;  %vm492_vm7 = vcmp.ge.f32.partialorder %v445_v41, 0.0  ;;  %v500_v45 = vmul.f32 0.2, %v445_v41 }
  0xc9   : > { %v465_v46 = vadd.f32 %v464_v42, %v296_v19  ;;  %v485_v47 = vadd.f32 %v484_v43, %v296_v19 }
  0xca   : > { %v507_v48 = vsel %vm491_vm6, %v425_v40, %v499_v44  ;;  %v508_v49 = vsel %vm492_vm7, %v445_v41, %v500_v45 }
  0xcb   : > { %v513_v50 = vpack.c.bf16 %v508_v49, %v507_v48  ;;  %vm493_vm8 = vcmp.ge.f32.partialorder %v465_v46, 0.0  ;;  %v501_v51 = vmul.f32 0.2, %v465_v46  ;;  %vm494_vm9 = vcmp.ge.f32.partialorder %v485_v47, 0.0 }
  0xcc   : > { %v502_v52 = vmul.f32 0.2, %v485_v47 }
  0xcd   : > { %517 = vst [vmem:[%s822_s11 + $0x10] sm:$0xff] %v513_v50  ;;  %v509_v53 = vsel %vm493_vm8, %v465_v46, %v501_v51 }
  0xce   : > { %v510_v54 = vsel %vm494_vm9, %v485_v47, %v502_v52 }
  0xcf   : > { %v514_v55 = vpack.c.bf16 %v510_v54, %v509_v53 }
  0xd1   : > { %518 = vst [vmem:[%s822_s11 + $0x18] sm:$0xff] %v514_v55 }
  0xd2 PF: > { %p10_p9 = scmp.ge.s32.totalorder %s699_s16, 4   ;;  %s842_s12 = smov %s655_s13 }
  0xd3   : > { %s843_s13 = smov %s708_s19  ;;  %s844_s14 = smov %s699_s16 }
  0xd4   :  { %12 = sbr.rel (!%p10_p9) target bundleno = 2 (0x2), region = 90 }

// kernel: discriminator_edges_forward.6
= control target key start
LH: loop header
LB: loop body
LE: loop exit
PB: predicated region body
PF: predicated region fallthrough
CT: control target
= control target key end

     0   :  { %v359_v3 = vmov 0   ;;  %vm88_vm0 = vcmask 588800   ;;  %s509_s0 = inlined_call_operand.vmem [shape: bf16[72,512], index: 0, kind: input, shape index: {}]   ;;  %s510_s2 = inlined_call_operand.vmem [shape: f32[16,1], index: 2, kind: input, shape index: {}]   ;;  %s511_s1 = inlined_call_operand.vmem [shape: f32[16,72], index: 1, kind: input, shape index: {}]   ;;  %s512_s3 = inlined_call_operand.vmem [shape: f32[16,1], index: 3, kind: input, shape index: {}]   ;;  %s513_s4 = inlined_call_operand.vmem [shape: f32[16,1], index: 4, kind: input, shape index: {}]   ;;  %s514_s5 = inlined_call_operand.vmem [shape: bf16[16,512], index: 5, kind: output, shape index: {}]  }
   0x1   :  { %v36_v0 = vld [vmem:[%s509_s0 + $0x80] sm:$0xff]  ;;  %v37_v1 = vld [vmem:[%s509_s0 + $0x88] sm:$0xff]  ;;  %v34_v2 = vld [vmem:[%s509_s0 + $0x70] sm:$0xff]  ;;  %350 = vset.pattern.permute.xlu0 %v359_v3  ;;  %351 = vset.pattern.permute.xlu1 %v359_v3 }
   0x2   :  { %v70_v4 = vunpack.c.l.bf16 %v36_v0  ;;  %v71_v5 = vunpack.c.h.bf16 %v36_v0  ;;  %v72_v6 = vunpack.c.l.bf16 %v37_v1  ;;  %v73_v7 = vunpack.c.h.bf16 %v37_v1  ;;  %v35_v8 = vld [vmem:[%s509_s0 + $0x78] sm:$0xff]  ;;  %v32_v9 = vld [vmem:[%s509_s0 + $0x60] sm:$0xff]  ;;  %v33_v10 = vld [vmem:[%s509_s0 + $0x68] sm:$0xff]  ;;  %352 = vset.pattern.permute.xlu2 %v359_v3 }
   0x3   :  { %v66_v11 = vunpack.c.l.bf16 %v34_v2  ;;  %v67_v12 = vunpack.c.h.bf16 %v34_v2  ;;  %v68_v13 = vunpack.c.l.bf16 %v35_v8  ;;  %v69_v14 = vunpack.c.h.bf16 %v35_v8  ;;  %v30_v15 = vld [vmem:[%s509_s0 + $0x50] sm:$0xff]  ;;  %v31_v18 = vld [vmem:[%s509_s0 + $0x58] sm:$0xff]  ;;  %v28_v21 = vld [vmem:[%s509_s0 + $0x40] sm:$0xff] }
   0x4   :  { %102 = vmatpush.msra.mxu0 %v70_v4  ;;  %125 = vmatpush.msra.mxu1 %v71_v5  ;;  %v62_v16 = vunpack.c.l.bf16 %v32_v9  ;;  %v63_v17 = vunpack.c.h.bf16 %v32_v9  ;;  %v64_v19 = vunpack.c.l.bf16 %v33_v10  ;;  %v65_v20 = vunpack.c.h.bf16 %v33_v10  ;;  %v29_v24 = vld [vmem:[%s509_s0 + $0x48] sm:$0xff]  ;;  %v26_v27 = vld [vmem:[%s509_s0 + $0x30] sm:$0xff]  ;;  %v27_v29 = vld [vmem:[%s509_s0 + $0x38] sm:$0xff] }
   0x5   :  { %148 = vmatpush.msra.mxu2 %v72_v6  ;;  %171 = vmatpush.msra.mxu3 %v73_v7  ;;  %v58_v22 = vunpack.c.l.bf16 %v30_v15  ;;  %v59_v23 = vunpack.c.h.bf16 %v30_v15  ;;  %v60_v25 = vunpack.c.l.bf16 %v31_v18  ;;  %v61_v26 = vunpack.c.h.bf16 %v31_v18  ;;  %v76_v30 = vld [vmem:[%s510_s2] sm:$0xff]  ;;  %v25_v36 = vld [vmem:[%s509_s0 + $0x28] sm:$0xff]  ;;  %v22_v39 = vld [vmem:[%s509_s0 + $0x10] sm:$0xff] }
   0x6   :  { %103 = vmatpush.msra.mxu0 %v66_v11  ;;  %126 = vmatpush.msra.mxu1 %v67_v12  ;;  %v54_v28 = vunpack.c.l.bf16 %v28_v21  ;;  %v55_v31 = vunpack.c.h.bf16 %v28_v21  ;;  %v56_v32 = vunpack.c.l.bf16 %v29_v24  ;;  %v24_v33 = vld [vmem:[%s509_s0 + $0x20] sm:$0xff]  ;;  %v57_v34 = vunpack.c.h.bf16 %v29_v24  ;;  %v23_v42 = vld [vmem:[%s509_s0 + $0x18] sm:$0xff]  ;;  %v21_v50 = vld [vmem:[%s509_s0 + $0x8] sm:$0xff] }
   0x7   :  { %149 = vmatpush.msra.mxu2 %v68_v13  ;;  %172 = vmatpush.msra.mxu3 %v69_v14  ;;  %v50_v35 = vunpack.c.l.bf16 %v26_v27  ;;  %v51_v37 = vunpack.c.h.bf16 %v26_v27  ;;  %v52_v38 = vunpack.c.l.bf16 %v27_v29  ;;  %v53_v40 = vunpack.c.h.bf16 %v27_v29  ;;  %v20_v47 = vld [vmem:[%s509_s0] sm:$0xff]  ;;  %v77_v52 = vld [vmem:[%s510_s2 + $0x8] sm:$0xff] }
   0x8   :  { %104 = vmatpush.msra.mxu0 %v62_v16  ;;  %127 = vmatpush.msra.mxu1 %v63_v17  ;;  %v46_v41 = vunpack.c.l.bf16 %v24_v33  ;;  %v47_v43 = vunpack.c.h.bf16 %v24_v33  ;;  %v48_v44 = vunpack.c.l.bf16 %v25_v36  ;;  %v49_v45 = vunpack.c.h.bf16 %v25_v36  ;;  %v74_v57 = vld [vmem:[%s511_s1] sm:$0xff]  ;;  %v75_v59 = vld [vmem:[%s511_s1 + $0x8] sm:$0xff] }
   0x9   :  { %150 = vmatpush.msra.mxu2 %v64_v19  ;;  %173 = vmatpush.msra.mxu3 %v65_v20  ;;  %v42_v46 = vunpack.c.l.bf16 %v22_v39  ;;  %v43_v48 = vunpack.c.h.bf16 %v22_v39  ;;  %v44_v49 = vunpack.c.l.bf16 %v23_v42  ;;  %v45_v51 = vunpack.c.h.bf16 %v23_v42  ;;  %v264_v58 = vld [vmem:[%s512_s3] sm:$0xff]  ;;  %v285_v60 = vld [vmem:[%s513_s4 + $0x8] sm:$0xff] }
   0xa   :  { %105 = vmatpush.msra.mxu0 %v58_v22  ;;  %128 = vmatpush.msra.mxu1 %v59_v23  ;;  %v38_v53 = vunpack.c.l.bf16 %v20_v47  ;;  %v39_v54 = vunpack.c.h.bf16 %v20_v47  ;;  %v40_v55 = vunpack.c.l.bf16 %v21_v50  ;;  %v41_v56 = vunpack.c.h.bf16 %v21_v50 }
   0xb   :  { %151 = vmatpush.msra.mxu2 %v60_v25  ;;  %174 = vmatpush.msra.mxu3 %v61_v26  ;;  %v360_v21 = vmov 512.0   ;;  %v265_v25 = vld [vmem:[%s512_s3 + $0x8] sm:$0xff] }
   0xc   :  { %80 = vperm.xlu0 %350, %v76_v30   ;;  %106 = vmatpush.msra.mxu0 %v54_v28  ;;  %353 = vrcp.f32 %v360_v21 }
   0xd   :  { %129 = vmatpush.msra.mxu1 %v55_v31  ;;  %152 = vmatpush.msra.mxu2 %v56_v32 }
   0xe   :  { %175 = vmatpush.msra.mxu3 %v57_v34  ;;  %107 = vmatpush.msra.mxu0 %v50_v35 }
   0xf   :  { %130 = vmatpush.msra.mxu1 %v51_v37  ;;  %153 = vmatpush.msra.mxu2 %v52_v38 }
  0x10   :  { %176 = vmatpush.msra.mxu3 %v53_v40  ;;  %108 = vmatpush.msra.mxu0 %v46_v41 }
  0x11   :  { %131 = vmatpush.msra.mxu1 %v47_v43  ;;  %154 = vmatpush.msra.mxu2 %v48_v44 }
  0x12   :  { %177 = vmatpush.msra.mxu3 %v49_v45  ;;  %109 = vmatpush.msra.mxu0 %v42_v46  ;;  %v354_v22 = vpop.eup %353 }
  0x13   :  { %132 = vmatpush.msra.mxu1 %v43_v48  ;;  %155 = vmatpush.msra.mxu2 %v44_v49  ;;  %v198_v23 = vmul.f32 512.0, %v354_v22  ;;  %vm202_vm1 = vweird.f32 %v354_v22 }
  0x14   :  { %178 = vmatpush.msra.mxu3 %v45_v51  ;;  %85 = vperm.xlu0 %350, %v77_v52  }
  0x15   :  { %110 = vmatpush.msra.mxu0 %v38_v53  ;;  %133 = vmatpush.msra.mxu1 %v39_v54  ;;  %v199_v24 = vsub.f32 1.0, %v198_v23 }
  0x16   :  { %156 = vmatpush.msra.mxu2 %v40_v55  ;;  %179 = vmatpush.msra.mxu3 %v41_v56  ;;  %v284_v55 = vld [vmem:[%s513_s4] sm:$0xff] }
  0x17   :  { %340 = vmatmul.msk.f32.vlgmr.msra.gmra.mxu0 %vm88_vm0, %v74_v57  ;;  %342 = vmatmul.msk.f32.vlgmr.msra.gmra.mxu1 %vm88_vm0, %v74_v57  ;;  %v200_v26 = vmul.f32 %v354_v22, %v199_v24 }
  0x18   :  { %344 = vmatmul.msk.f32.vlgmr.msra.gmra.mxu2 %vm88_vm0, %v74_v57  ;;  %346 = vmatmul.msk.f32.vlgmr.msra.gmra.mxu3 %vm88_vm0, %v74_v57 }
  0x19   :  { %v201_v27 = vadd.f32 %v354_v22, %v200_v26 }
  0x1b   :  { %v203_v28 = vsel %vm202_vm1, %v354_v22, %v201_v27 }
  0x1c   :  { %268 = vperm.xlu0 %350, %v264_v58  }
  0x1f   :  { %341 = vmatmul.msk.f32.gmra.mxu0 %vm88_vm0, %v75_v59  ;;  %343 = vmatmul.msk.f32.gmra.mxu1 %vm88_vm0, %v75_v59 }
  0x20   :  { %345 = vmatmul.msk.f32.gmra.mxu2 %vm88_vm0, %v75_v59  ;;  %347 = vmatmul.msk.f32.gmra.mxu3 %vm88_vm0, %v75_v59 }
  0x24   :  { %293 = vperm.xlu0 %350, %v285_v60  }
  0x7e   :  { %v81_v63 = vpop.permute.xlu0 %80 }
  0x86   :  { %v86_v10 = vpop.permute.xlu0 %85 }
  0x94   :  { %v112_v61 = vpop.f32.mrf.mxu0  ;;  %v135_v62 = vpop.f32.mrf.mxu1 }
  0x95   :  { %v113_v0 = vadd.f32 %v112_v61, %v81_v63  ;;  %v136_v1 = vadd.f32 %v135_v62, %v81_v63 }
  0x97   :  { %v187_v2 = vadd.f32 %v136_v1, %v113_v0 }
  0x9b   :  { %v158_v3 = vpop.f32.mrf.mxu2  ;;  %v181_v4 = vpop.f32.mrf.mxu3 }
  0x9c   :  { %v159_v5 = vadd.f32 %v158_v3, %v81_v63  ;;  %v115_v6 = vpop.f32.mrf.mxu0  ;;  %v138_v7 = vpop.f32.mrf.mxu1  ;;  %v182_v8 = vadd.f32 %v181_v4, %v81_v63 }
  0x9d   :  { %v116_v11 = vadd.f32 %v115_v6, %v86_v10  ;;  %v139_v12 = vadd.f32 %v138_v7, %v86_v10 }
  0x9e   :  { %v188_v9 = vadd.f32 %v187_v2, %v159_v5 }
  0x9f   :  { %v192_v16 = vadd.f32 %v139_v12, %v116_v11 }
  0xa0   :  { %v189_v13 = vadd.f32 %v188_v9, %v182_v8 }
  0xa2   :  { %190 = vadd.xlane.f32.xlu1 %v189_v13 }
  0xa3   :  { %v161_v14 = vpop.f32.mrf.mxu2  ;;  %v184_v15 = vpop.f32.mrf.mxu3 }
  0xa4   :  { %v162_v17 = vadd.f32 %v161_v14, %v86_v10  ;;  %v185_v19 = vadd.f32 %v184_v15, %v86_v10 }
  0xa6   :  { %v193_v18 = vadd.f32 %v192_v16, %v162_v17 }
  0xa8   :  { %v194_v20 = vadd.f32 %v193_v18, %v185_v19 }
  0xaa   :  { %195 = vadd.xlane.f32.xlu1 %v194_v20 }
  0xc3   :  { %273 = vperm.xlu1 %351, %v265_v25  }
 0x115   :  { %v191_v29 = vpop.xlane.xlu1 %190 }
 0x116   :  { %v204_v30 = vmul.f32 %v203_v28, %v191_v29 }
 0x118   :  { %v206_v31 = vsub.f32 %v113_v0, %v204_v30  ;;  %v207_v32 = vsub.f32 %v136_v1, %v204_v30  ;;  %v208_v33 = vsub.f32 %v159_v5, %v204_v30  ;;  %v209_v34 = vsub.f32 %v182_v8, %v204_v30 }
 0x11a   :  { %v214_v35 = vmul.f32 %v206_v31, %v206_v31  ;;  %v215_v36 = vmul.f32 %v207_v32, %v207_v32  ;;  %v216_v37 = vmul.f32 %v208_v33, %v208_v33  ;;  %v217_v41 = vmul.f32 %v209_v34, %v209_v34 }
 0x11c   :  { %v222_v38 = vadd.f32 %v215_v36, %v214_v35 }
 0x11d   :  { %v196_v39 = vpop.xlane.xlu1 %195 }
 0x11e   :  { %v205_v40 = vmul.f32 %v203_v28, %v196_v39  ;;  %v223_v42 = vadd.f32 %v222_v38, %v216_v37 }
 0x120   :  { %v474_v43 = vsub.f32 %v116_v11, %v205_v40  ;;  %v476_v44 = vsub.f32 %v139_v12, %v205_v40  ;;  %v224_v45 = vadd.f32 %v223_v42, %v217_v41  ;;  %v478_v46 = vsub.f32 %v162_v17, %v205_v40  ;;  %v269_v12 = vpop.permute.xlu0 %268 }
 0x121   :  { %v480_v47 = vsub.f32 %v185_v19, %v205_v40 }
 0x122   :  { %225 = vadd.xlane.f32.xlu2 %v224_v45  ;;  %v218_v48 = vmul.f32 %v474_v43, %v474_v43  ;;  %v219_v49 = vmul.f32 %v476_v44, %v476_v44  ;;  %v220_v50 = vmul.f32 %v478_v46, %v478_v46 }
 0x123   :  { %v221_v52 = vmul.f32 %v480_v47, %v480_v47 }
 0x124   :  { %v227_v51 = vadd.f32 %v219_v49, %v218_v48 }
 0x126   :  { %v228_v53 = vadd.f32 %v227_v51, %v220_v50 }
 0x128   :  { %v229_v54 = vadd.f32 %v228_v53, %v221_v52  ;;  %v294_v42 = vpop.permute.xlu0 %293 }
 0x12a   :  { %230 = vadd.xlane.f32.xlu2 %v229_v54 }
 0x135   :  { %v274_v29 = vpop.permute.xlu1 %273 }
 0x142   :  { %288 = vperm.xlu2 %352, %v284_v55  }
 0x195   :  { %v226_v56 = vpop.xlane.xlu2 %225 }
 0x196   :  { %v232_v57 = vmul.f32 %v226_v56, %v203_v28 }
 0x198   :  { %v234_v58 = vadd.f32 1e-05, %v232_v57 }
 0x19a   :  { %355 = vrsqrt.f32 %v234_v58  ;;  %vm242_vm3 = vweird.f32 %v234_v58 }
 0x19d   :  { %v231_v59 = vpop.xlane.xlu2 %230 }
 0x19e   :  { %v233_v60 = vmul.f32 %v231_v59, %v203_v28 }
 0x1a0   :  { %v356_v61 = vpop.eup %355  ;;  %v235_v62 = vadd.f32 1e-05, %v233_v60 }
 0x1a1   :  { %v237_v63 = vmul.f32 %v356_v61, %v234_v58  ;;  %vm243_vm2 = vweird.f32 %v356_v61 }
 0x1a2   :  { %357 = vrsqrt.f32 %v235_v62  ;;  %vm244_vm4 = vmor %vm242_vm3, %vm243_vm2  ;;  %vm252_vm6 = vweird.f32 %v235_v62 }
 0x1a3   :  { %v238_v0 = vmul.f32 %v356_v61, %v237_v63 }
 0x1a5   :  { %v239_v1 = vmul.f32 0.5, %v238_v0  ;;  %v289_v14 = vpop.permute.xlu2 %288 }
 0x1a7   :  { %v240_v2 = vsub.f32 1.5, %v239_v1 }
 0x1a8   :  { %v358_v3 = vpop.eup %357 }
 0x1a9   :  { %v241_v4 = vmul.f32 %v356_v61, %v240_v2  ;;  %v247_v5 = vmul.f32 %v358_v3, %v235_v62  ;;  %vm253_vm5 = vweird.f32 %v358_v3 }
 0x1aa   :  { %vm254_vm7 = vmor %vm252_vm6, %vm253_vm5 }
 0x1ab   :  { %v245_v6 = vsel %vm244_vm4, %v356_v61, %v241_v4  ;;  %v248_v7 = vmul.f32 %v358_v3, %v247_v5 }
 0x1ac   :  { %v256_v8 = vmul.f32 %v245_v6, %v206_v31  ;;  %v257_v9 = vmul.f32 %v245_v6, %v207_v32  ;;  %v258_v10 = vmul.f32 %v245_v6, %v208_v33  ;;  %v259_v11 = vmul.f32 %v245_v6, %v209_v34 }
 0x1ad   :  { %v249_v13 = vmul.f32 0.5, %v248_v7 }
 0x1ae   :  { %v276_v15 = vmul.f32 %v269_v12, %v256_v8  ;;  %v277_v16 = vmul.f32 %v269_v12, %v257_v9  ;;  %v278_v17 = vmul.f32 %v269_v12, %v258_v10  ;;  %v279_v18 = vmul.f32 %v269_v12, %v259_v11 }
 0x1af   :  { %v250_v19 = vsub.f32 1.5, %v249_v13 }
 0x1b0   :  { %v296_v20 = vadd.f32 %v289_v14, %v276_v15  ;;  %v297_v21 = vadd.f32 %v289_v14, %v277_v16  ;;  %v298_v22 = vadd.f32 %v289_v14, %v278_v17  ;;  %v299_v23 = vadd.f32 %v289_v14, %v279_v18 }
 0x1b1   :  { %v251_v24 = vmul.f32 %v358_v3, %v250_v19 }
 0x1b2   :  { %vm304_vm8 = vcmp.ge.f32.partialorder %v296_v20, 0.0  ;;  %vm305_vm9 = vcmp.ge.f32.partialorder %v297_v21, 0.0  ;;  %vm306_vm10 = vcmp.ge.f32.partialorder %v298_v22, 0.0  ;;  %vm307_vm11 = vcmp.ge.f32.partialorder %v299_v23, 0.0 }
 0x1b3   :  { %v255_v25 = vsel %vm254_vm7, %v358_v3, %v251_v24  ;;  %v312_v26 = vmul.f32 0.2, %v296_v20  ;;  %v313_v27 = vmul.f32 0.2, %v297_v21  ;;  %v314_v28 = vmul.f32 0.2, %v298_v22 }
 0x1b4   :  { %v315_v30 = vmul.f32 0.2, %v299_v23  ;;  %v260_v31 = vmul.f32 %v255_v25, %v474_v43  ;;  %v261_v32 = vmul.f32 %v255_v25, %v476_v44  ;;  %v262_v33 = vmul.f32 %v255_v25, %v478_v46 }
 0x1b5   :  { %v320_v34 = vsel %vm304_vm8, %v296_v20, %v312_v26  ;;  %v321_v35 = vsel %vm305_vm9, %v297_v21, %v313_v27  ;;  %v322_v36 = vsel %vm306_vm10, %v298_v22, %v314_v28  ;;  %v263_v37 = vmul.f32 %v255_v25, %v480_v47 }
 0x1b6   :  { %v323_v38 = vsel %vm307_vm11, %v299_v23, %v315_v30  ;;  %v328_v39 = vpack.c.bf16 %v321_v35, %v320_v34  ;;  %v280_v40 = vmul.f32 %v274_v29, %v260_v31  ;;  %v281_v41 = vmul.f32 %v274_v29, %v261_v32 }
 0x1b7   :  { %v329_v45 = vpack.c.bf16 %v323_v38, %v322_v36  ;;  %v282_v48 = vmul.f32 %v274_v29, %v262_v33  ;;  %v283_v49 = vmul.f32 %v274_v29, %v263_v37 }
 0x1b8   :  { %332 = vst [vmem:[%s514_s5] sm:$0xff] %v328_v39  ;;  %v300_v43 = vadd.f32 %v294_v42, %v280_v40  ;;  %v301_v44 = vadd.f32 %v294_v42, %v281_v41 }
 0x1b9   :  { %333 = vst [vmem:[%s514_s5 + $0x8] sm:$0xff] %v329_v45  ;;  %v302_v46 = vadd.f32 %v294_v42, %v282_v48  ;;  %v303_v47 = vadd.f32 %v294_v42, %v283_v49 }
 0x1ba   :  { %vm308_vm12 = vcmp.ge.f32.partialorder %v300_v43, 0.0  ;;  %vm309_vm13 = vcmp.ge.f32.partialorder %v301_v44, 0.0  ;;  %v316_v50 = vmul.f32 0.2, %v300_v43  ;;  %v317_v51 = vmul.f32 0.2, %v301_v44 }
 0x1bb   :  { %vm310_vm14 = vcmp.ge.f32.partialorder %v302_v46, 0.0  ;;  %vm311_vm15 = vcmp.ge.f32.partialorder %v303_v47, 0.0  ;;  %v318_v52 = vmul.f32 0.2, %v302_v46  ;;  %v319_v53 = vmul.f32 0.2, %v303_v47 }
 0x1bc   :  { %v324_v54 = vsel %vm308_vm12, %v300_v43, %v316_v50  ;;  %v325_v55 = vsel %vm309_vm13, %v301_v44, %v317_v51 }
 0x1bd   :  { %v326_v56 = vsel %vm310_vm14, %v302_v46, %v318_v52  ;;  %v327_v57 = vsel %vm311_vm15, %v303_v47, %v319_v53  ;;  %v330_v58 = vpack.c.bf16 %v325_v55, %v324_v54 }
 0x1be   :  { %v331_v59 = vpack.c.bf16 %v327_v57, %v326_v56 }
 0x1bf   :  { %334 = vst [vmem:[%s514_s5 + $0x10] sm:$0xff] %v330_v58 }
 0x1c0   :  { %335 = vst [vmem:[%s514_s5 + $0x18] sm:$0xff] %v331_v59 }

// kernel: discriminator_edges_forward.7
= control target key start
LH: loop header
LB: loop body
LE: loop exit
PB: predicated region body
PF: predicated region fallthrough
CT: control target
= control target key end

     0   :  { %vm88_vm0 = vcmask 130048   ;;  %v432_v17 = vmov 0   ;;  %s574_s0 = inlined_call_operand.vmem [shape: bf16[144,128], index: 0, kind: input, shape index: {}]   ;;  %s575_s1 = inlined_call_operand.vmem [shape: f32[32,144], index: 1, kind: input, shape index: {}]   ;;  %s576_s2 = inlined_call_operand.vmem [shape: f32[32,1], index: 2, kind: input, shape index: {}]   ;;  %s577_s3 = inlined_call_operand.vmem [shape: f32[32,1], index: 3, kind: input, shape index: {}]   ;;  %s578_s4 = inlined_call_operand.vmem [shape: f32[32,1], index: 4, kind: input, shape index: {}]   ;;  %s579_s5 = inlined_call_operand.vmem [shape: bf16[32,128], index: 5, kind: output, shape index: {}]  }
   0x1   :  { %v382_v0 = vld [vmem:[%s574_s0 + $0x38] sm:$0xff]   ;;  %v381_v1 = vld [vmem:[%s574_s0 + $0x30] sm:$0xff]   ;;  %v383_v4 = vld [vmem:[%s574_s0 + $0x40] sm:$0xff]   ;;  %419 = vset.pattern.permute.xlu0 %v432_v17  ;;  %420 = vset.pattern.permute.xlu1 %v432_v17 }
   0x2   :  { %v361_v2 = vunpack.c.h.bf16 %v382_v0  ;;  %v360_v3 = vunpack.c.l.bf16 %v382_v0  ;;  %v357_v5 = vunpack.c.h.bf16 %v381_v1  ;;  %v365_v6 = vunpack.c.h.bf16 %v383_v4  ;;  %v380_v7 = vld [vmem:[%s574_s0 + $0x28] sm:$0xff]   ;;  %v379_v12 = vld [vmem:[%s574_s0 + $0x20] sm:$0xff]   ;;  %v378_v16 = vld [vmem:[%s574_s0 + $0x18] sm:$0xff]   ;;  %421 = vset.pattern.permute.xlu2 %v432_v17 }
   0x3   :  { %v364_v8 = vunpack.c.l.bf16 %v383_v4  ;;  %v356_v9 = vunpack.c.l.bf16 %v381_v1  ;;  %v353_v10 = vunpack.c.h.bf16 %v380_v7  ;;  %v57_v11 = vld [vmem:[%s575_s1 + $0x8] sm:$0xff]  ;;  %v352_v13 = vunpack.c.l.bf16 %v380_v7  ;;  %v64_v15 = vld [vmem:[%s576_s2] sm:$0xff]  ;;  %v59_v20 = vld [vmem:[%s575_s1 + $0x18] sm:$0xff] }
   0x4   :  { %101 = vmatpush.msra.mxu0 %v361_v2  ;;  %385 = vmatpush.msra.mxu2 %v361_v2  ;;  %v349_v14 = vunpack.c.h.bf16 %v379_v12  ;;  %v348_v18 = vunpack.c.l.bf16 %v379_v12  ;;  %v345_v19 = vunpack.c.h.bf16 %v378_v16  ;;  %v377_v21 = vld [vmem:[%s574_s0 + $0x10] sm:$0xff]   ;;  %v344_v22 = vunpack.c.l.bf16 %v378_v16  ;;  %v65_v25 = vld [vmem:[%s576_s2 + $0x8] sm:$0xff]  ;;  %v331_v30 = vld [vmem:[%s574_s0] sm:$0xff]  }
   0x5   :  { %386 = vmatpush.msra.mxu3 %v361_v2  ;;  %144 = vmatpush.msra.mxu1 %v365_v6  ;;  %v66_v23 = vld [vmem:[%s576_s2 + $0x10] sm:$0xff]  ;;  %v341_v24 = vunpack.c.h.bf16 %v377_v21  ;;  %v376_v26 = vld [vmem:[%s574_s0 + $0x8] sm:$0xff]   ;;  %v340_v27 = vunpack.c.l.bf16 %v377_v21  ;;  %v67_v32 = vld [vmem:[%s576_s2 + $0x18] sm:$0xff]  ;;  %v333_v33 = vunpack.c.h.bf16 %v331_v30  ;;  %v332_v34 = vunpack.c.l.bf16 %v331_v30 }
   0x6   :  { %102 = vmatpush.msra.mxu0 %v360_v3  ;;  %387 = vmatpush.msra.mxu2 %v360_v3  ;;  %v337_v28 = vunpack.c.h.bf16 %v376_v26  ;;  %v61_v29 = vld [vmem:[%s575_s1 + $0x28] sm:$0xff]  ;;  %v336_v31 = vunpack.c.l.bf16 %v376_v26  ;;  %v56_v35 = vld [vmem:[%s575_s1] sm:$0xff]  ;;  %v58_v36 = vld [vmem:[%s575_s1 + $0x10] sm:$0xff] }
   0x7   :  { %388 = vmatpush.msra.mxu3 %v360_v3  ;;  %145 = vmatpush.msra.mxu1 %v364_v8  ;;  %v60_v37 = vld [vmem:[%s575_s1 + $0x20] sm:$0xff]  ;;  %v63_v38 = vld [vmem:[%s575_s1 + $0x38] sm:$0xff]  ;;  %v62_v39 = vld [vmem:[%s575_s1 + $0x30] sm:$0xff]  ;;  %v433_v3 = vmov 128.0  }
   0x8   :  { %103 = vmatpush.msra.mxu0 %v357_v5  ;;  %389 = vmatpush.msra.mxu2 %v357_v5  ;;  %v247_v60 = vld [vmem:[%s577_s3 + $0x8] sm:$0xff]  ;;  %v246_v61 = vld [vmem:[%s577_s3] sm:$0xff]  ;;  %v248_v63 = vld [vmem:[%s577_s3 + $0x10] sm:$0xff]  ;;  %422 = vrcp.f32 %v433_v3 }
   0x9   :  { %390 = vmatpush.msra.mxu3 %v357_v5  ;;  %326 = vmatmul.msk.f32.vlgmr.msra.gmra.mxu1 %vm88_vm0, %v57_v11  ;;  %v274_v62 = vld [vmem:[%s578_s4] sm:$0xff]  ;;  %v249_v0 = vld [vmem:[%s577_s3 + $0x18] sm:$0xff]  ;;  %v276_v2 = vld [vmem:[%s578_s4 + $0x10] sm:$0xff] }
   0xa   :  { %104 = vmatpush.msra.mxu0 %v356_v9  ;;  %391 = vmatpush.msra.mxu2 %v356_v9  ;;  %v277_v1 = vld [vmem:[%s578_s4 + $0x18] sm:$0xff]  ;;  %v275_v26 = vld [vmem:[%s578_s4 + $0x8] sm:$0xff] }
   0xb   :  { %392 = vmatpush.msra.mxu3 %v356_v9  ;;  %70 = vperm.xlu0 %419, %v64_v15  }
   0xc   :  { %105 = vmatpush.msra.mxu0 %v353_v10  ;;  %393 = vmatpush.msra.mxu2 %v353_v10 }
   0xd   :  { %394 = vmatpush.msra.mxu3 %v353_v10  ;;  %80 = vperm.xlu1 %420, %v66_v23  }
   0xe   :  { %106 = vmatpush.msra.mxu0 %v352_v13  ;;  %395 = vmatpush.msra.mxu2 %v352_v13  ;;  %v423_v4 = vpop.eup %422 }
   0xf   :  { %396 = vmatpush.msra.mxu3 %v352_v13  ;;  %v168_v5 = vmul.f32 128.0, %v423_v4  ;;  %vm172_vm1 = vweird.f32 %v423_v4 }
  0x10   :  { %107 = vmatpush.msra.mxu0 %v349_v14  ;;  %397 = vmatpush.msra.mxu2 %v349_v14 }
  0x11   :  { %398 = vmatpush.msra.mxu3 %v349_v14  ;;  %327 = vmatmul.msk.f32.gmra.mxu1 %vm88_vm0, %v59_v20  ;;  %v169_v6 = vsub.f32 1.0, %v168_v5 }
  0x12   :  { %108 = vmatpush.msra.mxu0 %v348_v18  ;;  %399 = vmatpush.msra.mxu2 %v348_v18 }
  0x13   :  { %400 = vmatpush.msra.mxu3 %v348_v18  ;;  %75 = vperm.xlu0 %419, %v65_v25   ;;  %v170_v7 = vmul.f32 %v423_v4, %v169_v6 }
  0x14   :  { %109 = vmatpush.msra.mxu0 %v345_v19  ;;  %401 = vmatpush.msra.mxu2 %v345_v19 }
  0x15   :  { %402 = vmatpush.msra.mxu3 %v345_v19  ;;  %85 = vperm.xlu1 %420, %v67_v32   ;;  %v171_v8 = vadd.f32 %v423_v4, %v170_v7 }
  0x16   :  { %110 = vmatpush.msra.mxu0 %v344_v22  ;;  %403 = vmatpush.msra.mxu2 %v344_v22 }
  0x17   :  { %404 = vmatpush.msra.mxu3 %v344_v22  ;;  %v173_v9 = vsel %vm172_vm1, %v423_v4, %v171_v8 }
  0x18   :  { %111 = vmatpush.msra.mxu0 %v341_v24  ;;  %405 = vmatpush.msra.mxu2 %v341_v24 }
  0x19   :  { %406 = vmatpush.msra.mxu3 %v341_v24  ;;  %328 = vmatmul.msk.f32.gmra.mxu1 %vm88_vm0, %v61_v29 }
  0x1a   :  { %112 = vmatpush.msra.mxu0 %v340_v27  ;;  %407 = vmatpush.msra.mxu2 %v340_v27 }
  0x1b   :  { %408 = vmatpush.msra.mxu3 %v340_v27 }
  0x1c   :  { %113 = vmatpush.msra.mxu0 %v337_v28  ;;  %409 = vmatpush.msra.mxu2 %v337_v28 }
  0x1d   :  { %410 = vmatpush.msra.mxu3 %v337_v28 }
  0x1e   :  { %114 = vmatpush.msra.mxu0 %v336_v31  ;;  %411 = vmatpush.msra.mxu2 %v336_v31 }
  0x1f   :  { %412 = vmatpush.msra.mxu3 %v336_v31 }
  0x20   :  { %115 = vmatpush.msra.mxu0 %v333_v33  ;;  %413 = vmatpush.msra.mxu2 %v333_v33 }
  0x21   :  { %414 = vmatpush.msra.mxu3 %v333_v33  ;;  %329 = vmatmul.msk.f32.gmra.mxu1 %vm88_vm0, %v63_v38 }
  0x22   :  { %116 = vmatpush.msra.mxu0 %v332_v34  ;;  %415 = vmatpush.msra.mxu2 %v332_v34 }
  0x23   :  { %416 = vmatpush.msra.mxu3 %v332_v34  ;;  %117 = vmatmul.f32.vlgmr.msra.gmra.mxu0 %v56_v35 }
  0x24   :  { %120 = vmatmul.f32.vlgmr.msra.gmra.mxu2 %v58_v36  ;;  %123 = vmatmul.f32.vlgmr.msra.gmra.mxu3 %v60_v37 }
  0x2c   :  { %126 = vmatmul.f32.gmra.mxu3 %v62_v39 }
  0x7d   :  { %v71_v42 = vpop.permute.xlu0 %70 }
  0x7f   :  { %v81_v46 = vpop.permute.xlu1 %80 }
  0x85   :  { %v76_v48 = vpop.permute.xlu0 %75 }
  0x86   :  { %v147_v40 = vpop.f32.mrf.mxu1 }
  0x87   :  { %v86_v55 = vpop.permute.xlu1 %85 }
  0x8e   :  { %v150_v41 = vpop.f32.mrf.mxu1 }
  0x96   :  { %v153_v47 = vpop.f32.mrf.mxu1 }
  0x9e   :  { %v156_v57 = vpop.f32.mrf.mxu1 }
  0xa0   :  { %v118_v43 = vpop.f32.mrf.mxu0 }
  0xa1   :  { %v119_v44 = vadd.f32 %v118_v43, %v71_v42 }
  0xa3   :  { %v148_v45 = vadd.f32 %v147_v40, %v119_v44 }
  0xa5   :  { %159 = vadd.xlane.f32.xlu2 %v148_v45 }
  0xa7   :  { %v121_v49 = vpop.f32.mrf.mxu2  ;;  %v124_v50 = vpop.f32.mrf.mxu3 }
  0xa8   :  { %v122_v51 = vadd.f32 %v121_v49, %v76_v48  ;;  %v125_v52 = vadd.f32 %v124_v50, %v81_v46 }
  0xaa   :  { %v154_v53 = vadd.f32 %v153_v47, %v125_v52  ;;  %v151_v54 = vadd.f32 %v150_v41, %v122_v51 }
  0xac   :  { %163 = vadd.xlane.f32.xlu0 %v154_v53 }
  0xad   :  { %161 = vadd.xlane.f32.xlu2 %v151_v54 }
  0xaf   :  { %v127_v56 = vpop.f32.mrf.mxu3 }
  0xb0   :  { %v128_v58 = vadd.f32 %v127_v56, %v86_v55 }
  0xb2   :  { %v157_v59 = vadd.f32 %v156_v57, %v128_v58 }
  0xb4   :  { %165 = vadd.xlane.f32.xlu1 %v157_v59 }
  0xc0   :  { %257 = vperm.xlu0 %419, %v247_v60  }
  0xc5   :  { %252 = vperm.xlu2 %421, %v246_v61  }
  0xc8   :  { %280 = vperm.xlu0 %419, %v274_v62  }
  0xcd   :  { %262 = vperm.xlu1 %420, %v248_v63   ;;  %267 = vperm.xlu2 %421, %v249_v0  }
  0xd0   :  { %295 = vperm.xlu0 %419, %v277_v1  }
  0xd5   :  { %290 = vperm.xlu1 %420, %v276_v2  }
 0x118   :  { %v160_v10 = vpop.xlane.xlu2 %159 }
 0x119   :  { %v174_v11 = vmul.f32 %v173_v9, %v160_v10 }
 0x11b   :  { %v178_v12 = vsub.f32 %v148_v45, %v174_v11 }
 0x11d   :  { %v182_v13 = vmul.f32 %v178_v12, %v178_v12 }
 0x11f   :  { %186 = vadd.xlane.f32.xlu2 %v182_v13  ;;  %v164_v16 = vpop.xlane.xlu0 %163 }
 0x120   :  { %v162_v14 = vpop.xlane.xlu2 %161  ;;  %v176_v18 = vmul.f32 %v173_v9, %v164_v16 }
 0x121   :  { %v175_v15 = vmul.f32 %v173_v9, %v162_v14 }
 0x122   :  { %v552_v20 = vsub.f32 %v154_v53, %v176_v18 }
 0x123   :  { %v179_v17 = vsub.f32 %v151_v54, %v175_v15 }
 0x124   :  { %v184_v23 = vmul.f32 %v552_v20, %v552_v20 }
 0x125   :  { %v183_v19 = vmul.f32 %v179_v17, %v179_v17 }
 0x127   :  { %188 = vadd.xlane.f32.xlu2 %v183_v19  ;;  %v166_v21 = vpop.xlane.xlu1 %165 }
 0x128   :  { %v177_v22 = vmul.f32 %v173_v9, %v166_v21  ;;  %v253_v27 = vpop.permute.xlu2 %252 }
 0x12a   :  { %v556_v24 = vsub.f32 %v157_v59, %v177_v22 }
 0x12c   :  { %v185_v25 = vmul.f32 %v556_v24, %v556_v24 }
 0x12f   :  { %190 = vadd.xlane.f32.xlu2 %v184_v23 }
 0x130   :  { %v563_v28 = vpop.permute.xlu2 %267 }
 0x132   :  { %v258_v44 = vpop.permute.xlu0 %257 }
 0x137   :  { %192 = vadd.xlane.f32.xlu2 %v185_v25 }
 0x13a   :  { %v281_v59 = vpop.permute.xlu0 %280 }
 0x13f   :  { %v263_v7 = vpop.permute.xlu1 %262 }
 0x147   :  { %v291_v22 = vpop.permute.xlu1 %290 }
 0x14f   :  { %285 = vperm.xlu2 %421, %v275_v26  }
 0x192   :  { %v187_v29 = vpop.xlane.xlu2 %186 }
 0x193   :  { %v194_v30 = vmul.f32 %v187_v29, %v173_v9 }
 0x195   :  { %v198_v31 = vadd.f32 1e-05, %v194_v30 }
 0x197   :  { %424 = vrsqrt.f32 %v198_v31  ;;  %vm208_vm3 = vweird.f32 %v198_v31 }
 0x19a   :  { %v189_v32 = vpop.xlane.xlu2 %188 }
 0x19b   :  { %v195_v33 = vmul.f32 %v189_v32, %v173_v9 }
 0x19d   :  { %v425_v34 = vpop.eup %424  ;;  %v199_v35 = vadd.f32 1e-05, %v195_v33 }
 0x19e   :  { %v203_v36 = vmul.f32 %v425_v34, %v198_v31  ;;  %vm209_vm2 = vweird.f32 %v425_v34 }
 0x19f   :  { %426 = vrsqrt.f32 %v199_v35  ;;  %vm210_vm4 = vmor %vm208_vm3, %vm209_vm2  ;;  %vm218_vm6 = vweird.f32 %v199_v35 }
 0x1a0   :  { %v204_v37 = vmul.f32 %v425_v34, %v203_v36 }
 0x1a2   :  { %v205_v38 = vmul.f32 0.5, %v204_v37  ;;  %v191_v39 = vpop.xlane.xlu2 %190 }
 0x1a3   :  { %v196_v40 = vmul.f32 %v191_v39, %v173_v9 }
 0x1a4   :  { %v206_v41 = vsub.f32 1.5, %v205_v38 }
 0x1a5   :  { %v427_v42 = vpop.eup %426  ;;  %v200_v43 = vadd.f32 1e-05, %v196_v40 }
 0x1a6   :  { %v207_v45 = vmul.f32 %v425_v34, %v206_v41  ;;  %v213_v46 = vmul.f32 %v427_v42, %v199_v35  ;;  %vm219_vm5 = vweird.f32 %v427_v42 }
 0x1a7   :  { %428 = vrsqrt.f32 %v200_v43  ;;  %vm220_vm7 = vmor %vm218_vm6, %vm219_vm5  ;;  %vm228_vm9 = vweird.f32 %v200_v43 }
 0x1a8   :  { %v211_v47 = vsel %vm210_vm4, %v425_v34, %v207_v45  ;;  %v214_v48 = vmul.f32 %v427_v42, %v213_v46 }
 0x1a9   :  { %v242_v49 = vmul.f32 %v211_v47, %v178_v12 }
 0x1aa   :  { %v215_v50 = vmul.f32 0.5, %v214_v48  ;;  %v193_v51 = vpop.xlane.xlu2 %192 }
 0x1ab   :  { %v197_v52 = vmul.f32 %v193_v51, %v173_v9  ;;  %v270_v55 = vmul.f32 %v253_v27, %v242_v49  ;;  %v296_v27 = vpop.permute.xlu0 %295 }
 0x1ac   :  { %v216_v53 = vsub.f32 1.5, %v215_v50 }
 0x1ad   :  { %v429_v54 = vpop.eup %428  ;;  %v201_v56 = vadd.f32 1e-05, %v197_v52  ;;  %v298_v63 = vadd.f32 %v281_v59, %v270_v55 }
 0x1ae   :  { %v223_v57 = vmul.f32 %v429_v54, %v200_v43  ;;  %v217_v58 = vmul.f32 %v427_v42, %v216_v53  ;;  %vm229_vm8 = vweird.f32 %v429_v54 }
 0x1af   :  { %430 = vrsqrt.f32 %v201_v56  ;;  %v306_v5 = vmul.f32 0.2, %v298_v63  ;;  %vm302_vm10 = vcmp.ge.f32.partialorder %v298_v63, 0.0  ;;  %vm230_vm11 = vmor %vm228_vm9, %vm229_vm8  ;;  %vm238_vm14 = vweird.f32 %v201_v56 }
 0x1b0   :  { %v224_v60 = vmul.f32 %v429_v54, %v223_v57  ;;  %v221_v61 = vsel %vm220_vm7, %v427_v42, %v217_v58 }
 0x1b1   :  { %v243_v62 = vmul.f32 %v221_v61, %v179_v17  ;;  %v310_v14 = vsel %vm302_vm10, %v298_v63, %v306_v5 }
 0x1b2   :  { %v225_v0 = vmul.f32 0.5, %v224_v60  ;;  %v286_v3 = vpop.permute.xlu2 %285 }
 0x1b3   :  { %v271_v1 = vmul.f32 %v258_v44, %v243_v62 }
 0x1b4   :  { %v226_v2 = vsub.f32 1.5, %v225_v0 }
 0x1b5   :  { %v431_v4 = vpop.eup %430  ;;  %v299_v6 = vadd.f32 %v286_v3, %v271_v1 }
 0x1b6   :  { %v227_v8 = vmul.f32 %v429_v54, %v226_v2  ;;  %v233_v9 = vmul.f32 %v431_v4, %v201_v56  ;;  %vm239_vm13 = vweird.f32 %v431_v4 }
 0x1b7   :  { %vm303_vm12 = vcmp.ge.f32.partialorder %v299_v6, 0.0  ;;  %v307_v10 = vmul.f32 0.2, %v299_v6  ;;  %vm240_vm15 = vmor %vm238_vm14, %vm239_vm13 }
 0x1b8   :  { %v231_v11 = vsel %vm230_vm11, %v429_v54, %v227_v8  ;;  %v234_v12 = vmul.f32 %v431_v4, %v233_v9 }
 0x1b9   :  { %v244_v13 = vmul.f32 %v231_v11, %v552_v20  ;;  %v311_v15 = vsel %vm303_vm12, %v299_v6, %v307_v10 }
 0x1ba   :  { %v235_v16 = vmul.f32 0.5, %v234_v12  ;;  %v369_v17 = vpack.c.bf16 %v311_v15, %v310_v14 }
 0x1bb   :  { %v272_v19 = vmul.f32 %v263_v7, %v244_v13 }
 0x1bc   :  { %v236_v18 = vsub.f32 1.5, %v235_v16  ;;  %370 = vst [vmem:[%s579_s5] sm:$0xff] %v369_v17  }
 0x1bd   :  { %v300_v25 = vadd.f32 %v291_v22, %v272_v19 }
 0x1be   :  { %v237_v21 = vmul.f32 %v431_v4, %v236_v18 }
 0x1bf   :  { %v308_v30 = vmul.f32 0.2, %v300_v25  ;;  %vm304_vm0 = vcmp.ge.f32.partialorder %v300_v25, 0.0 }
 0x1c0   :  { %v241_v23 = vsel %vm240_vm15, %v431_v4, %v237_v21 }
 0x1c1   :  { %v245_v26 = vmul.f32 %v241_v23, %v556_v24  ;;  %v312_v32 = vsel %vm304_vm0, %v300_v25, %v308_v30 }
 0x1c3   :  { %v273_v20 = vmul.f32 %v563_v28, %v245_v26 }
 0x1c5   :  { %v301_v29 = vadd.f32 %v296_v27, %v273_v20 }
 0x1c7   :  { %vm305_vm1 = vcmp.ge.f32.partialorder %v301_v29, 0.0  ;;  %v309_v31 = vmul.f32 0.2, %v301_v29 }
 0x1c9   :  { %v313_v33 = vsel %vm305_vm1, %v301_v29, %v309_v31 }
 0x1ca   :  { %v374_v34 = vpack.c.bf16 %v313_v33, %v312_v32 }
 0x1cc   :  { %384 = vst [vmem:[%s579_s5 + $0x8] sm:$0xff] %v374_v34  }

// kernel: discriminator_edges_forward.8
= control target key start
LH: loop header
LB: loop body
LE: loop exit
PB: predicated region body
PF: predicated region fallthrough
CT: control target
= control target key end

     0   :  { %vm128_vm0 = vcmask 261120   ;;  %v531_v40 = vmov 0   ;;  %s735_s0 = inlined_call_operand.vmem [shape: bf16[288,128], index: 0, kind: input, shape index: {}]   ;;  %s736_s1 = inlined_call_operand.vmem [shape: f32[32,288], index: 1, kind: input, shape index: {}]   ;;  %s737_s2 = inlined_call_operand.vmem [shape: f32[32,1], index: 2, kind: input, shape index: {}]   ;;  %s738_s3 = inlined_call_operand.vmem [shape: f32[32,1], index: 3, kind: input, shape index: {}]   ;;  %s739_s4 = inlined_call_operand.vmem [shape: f32[32,1], index: 4, kind: input, shape index: {}]   ;;  %s740_s5 = inlined_call_operand.vmem [shape: bf16[32,128], index: 5, kind: output, shape index: {}]  }
   0x1   :  { %v491_v0 = vld [vmem:[%s735_s0 + $0x38] sm:$0xff]   ;;  %v490_v2 = vld [vmem:[%s735_s0 + $0x30] sm:$0xff]   ;;  %v489_v10 = vld [vmem:[%s735_s0 + $0x28] sm:$0xff]   ;;  %520 = vset.pattern.permute.xlu0 %v531_v40  ;;  %521 = vset.pattern.permute.xlu1 %v531_v40 }
   0x2   :  { %v499_v1 = vld [vmem:[%s735_s0 + $0x78] sm:$0xff]   ;;  %v434_v3 = vunpack.c.h.bf16 %v491_v0  ;;  %v433_v5 = vunpack.c.l.bf16 %v491_v0  ;;  %v498_v6 = vld [vmem:[%s735_s0 + $0x70] sm:$0xff]   ;;  %v430_v8 = vunpack.c.h.bf16 %v490_v2  ;;  %v501_v11 = vld [vmem:[%s735_s0 + $0x88] sm:$0xff]   ;;  %v429_v12 = vunpack.c.l.bf16 %v490_v2  ;;  %522 = vset.pattern.permute.xlu2 %v531_v40 }
   0x3   :  { %v466_v4 = vunpack.c.h.bf16 %v499_v1  ;;  %v465_v7 = vunpack.c.l.bf16 %v499_v1  ;;  %v462_v9 = vunpack.c.h.bf16 %v498_v6  ;;  %v497_v13 = vld [vmem:[%s735_s0 + $0x68] sm:$0xff]   ;;  %v500_v14 = vld [vmem:[%s735_s0 + $0x80] sm:$0xff]   ;;  %v461_v15 = vunpack.c.l.bf16 %v498_v6  ;;  %v487_v28 = vld [vmem:[%s735_s0 + $0x18] sm:$0xff]  }
   0x4   :  { %141 = vmatpush.msra.mxu0 %v434_v3  ;;  %503 = vmatpush.msra.mxu3 %v434_v3  ;;  %v474_v16 = vunpack.c.h.bf16 %v501_v11  ;;  %v426_v17 = vunpack.c.h.bf16 %v489_v10  ;;  %v473_v18 = vunpack.c.l.bf16 %v501_v11  ;;  %v458_v19 = vunpack.c.h.bf16 %v497_v13  ;;  %v488_v20 = vld [vmem:[%s735_s0 + $0x20] sm:$0xff]   ;;  %v495_v30 = vld [vmem:[%s735_s0 + $0x58] sm:$0xff]   ;;  %v94_v31 = vld [vmem:[%s736_s1 + $0x10] sm:$0xff] }
   0x5   :  { %170 = vmatpush.msra.mxu1 %v466_v4  ;;  %v470_v21 = vunpack.c.h.bf16 %v500_v14  ;;  %v425_v22 = vunpack.c.l.bf16 %v489_v10  ;;  %v496_v23 = vld [vmem:[%s735_s0 + $0x60] sm:$0xff]   ;;  %v457_v24 = vunpack.c.l.bf16 %v497_v13  ;;  %v469_v25 = vunpack.c.l.bf16 %v500_v14  ;;  %v486_v35 = vld [vmem:[%s735_s0 + $0x10] sm:$0xff]   ;;  %v485_v43 = vld [vmem:[%s735_s0 + $0x8] sm:$0xff]  }
   0x6   :  { %142 = vmatpush.msra.mxu0 %v433_v5  ;;  %504 = vmatpush.msra.mxu3 %v433_v5  ;;  %v422_v26 = vunpack.c.h.bf16 %v488_v20  ;;  %v454_v27 = vunpack.c.h.bf16 %v496_v23  ;;  %v421_v29 = vunpack.c.l.bf16 %v488_v20  ;;  %v453_v32 = vunpack.c.l.bf16 %v496_v23  ;;  %v494_v37 = vld [vmem:[%s735_s0 + $0x50] sm:$0xff]   ;;  %v104_v38 = vld [vmem:[%s737_s2] sm:$0xff]  ;;  %v493_v45 = vld [vmem:[%s735_s0 + $0x48] sm:$0xff]  }
   0x7   :  { %171 = vmatpush.msra.mxu1 %v465_v7  ;;  %211 = vmatpush.msra.mxu2 %v474_v16  ;;  %v418_v33 = vunpack.c.h.bf16 %v487_v28  ;;  %v450_v34 = vunpack.c.h.bf16 %v495_v30  ;;  %v417_v36 = vunpack.c.l.bf16 %v487_v28  ;;  %v449_v39 = vunpack.c.l.bf16 %v495_v30  ;;  %v97_v46 = vld [vmem:[%s736_s1 + $0x28] sm:$0xff]  ;;  %v106_v49 = vld [vmem:[%s737_s2 + $0x10] sm:$0xff]  ;;  %v404_v51 = vld [vmem:[%s735_s0] sm:$0xff]  }
   0x8   :  { %143 = vmatpush.msra.mxu0 %v430_v8  ;;  %505 = vmatpush.msra.mxu3 %v430_v8  ;;  %v414_v41 = vunpack.c.h.bf16 %v486_v35  ;;  %v446_v42 = vunpack.c.h.bf16 %v494_v37  ;;  %v413_v44 = vunpack.c.l.bf16 %v486_v35  ;;  %v445_v47 = vunpack.c.l.bf16 %v494_v37  ;;  %v492_v53 = vld [vmem:[%s735_s0 + $0x40] sm:$0xff]   ;;  %v105_v54 = vld [vmem:[%s737_s2 + $0x8] sm:$0xff]  ;;  %v95_v62 = vld [vmem:[%s736_s1 + $0x18] sm:$0xff] }
   0x9   :  { %172 = vmatpush.msra.mxu1 %v462_v9  ;;  %212 = vmatpush.msra.mxu2 %v473_v18  ;;  %v410_v48 = vunpack.c.h.bf16 %v485_v43  ;;  %v442_v50 = vunpack.c.h.bf16 %v493_v45  ;;  %v409_v52 = vunpack.c.l.bf16 %v485_v43  ;;  %v441_v55 = vunpack.c.l.bf16 %v493_v45  ;;  %v100_v59 = vld [vmem:[%s736_s1 + $0x40] sm:$0xff]  ;;  %v93_v63 = vld [vmem:[%s736_s1 + $0x8] sm:$0xff]  ;;  %v107_v0 = vld [vmem:[%s737_s2 + $0x18] sm:$0xff] }
   0xa   :  { %144 = vmatpush.msra.mxu0 %v429_v12  ;;  %506 = vmatpush.msra.mxu3 %v429_v12  ;;  %v406_v56 = vunpack.c.h.bf16 %v404_v51  ;;  %v438_v57 = vunpack.c.h.bf16 %v492_v53  ;;  %v405_v58 = vunpack.c.l.bf16 %v404_v51  ;;  %v437_v60 = vunpack.c.l.bf16 %v492_v53  ;;  %v92_v61 = vld [vmem:[%s736_s1] sm:$0xff]  ;;  %v103_v1 = vld [vmem:[%s736_s1 + $0x58] sm:$0xff]  ;;  %v98_v2 = vld [vmem:[%s736_s1 + $0x30] sm:$0xff] }
   0xb   :  { %173 = vmatpush.msra.mxu1 %v461_v15  ;;  %213 = vmatpush.msra.mxu2 %v470_v21  ;;  %v96_v3 = vld [vmem:[%s736_s1 + $0x20] sm:$0xff]  ;;  %v101_v4 = vld [vmem:[%s736_s1 + $0x48] sm:$0xff]  ;;  %v99_v5 = vld [vmem:[%s736_s1 + $0x38] sm:$0xff]  ;;  %v228_v8 = vlaneseq }
   0xc   :  { %145 = vmatpush.msra.mxu0 %v426_v17  ;;  %507 = vmatpush.msra.mxu3 %v426_v17  ;;  %v102_v6 = vld [vmem:[%s736_s1 + $0x50] sm:$0xff]  ;;  %v322_v43 = vld [vmem:[%s738_s3 + $0x18] sm:$0xff] }
   0xd   :  { %174 = vmatpush.msra.mxu1 %v458_v19  ;;  %214 = vmatpush.msra.mxu2 %v469_v25  ;;  %v668_v11 = vand.u32 127, %v228_v8  ;;  %v321_v45 = vld [vmem:[%s738_s3 + $0x10] sm:$0xff] }
   0xe   :  { %146 = vmatpush.msra.mxu0 %v425_v22  ;;  %508 = vmatpush.msra.mxu3 %v425_v22 }
   0xf   :  { %175 = vmatpush.msra.mxu1 %v457_v24  ;;  %399 = vmatmul.msk.f32.vlgmr.msra.gmra.mxu2 %vm128_vm0, %v94_v31  ;;  %vm230_vm1 = vcmp.lt.s32.totalorder %v668_v11, 32 }
  0x10   :  { %147 = vmatpush.msra.mxu0 %v422_v26  ;;  %509 = vmatpush.msra.mxu3 %v422_v26 }
  0x11   :  { %176 = vmatpush.msra.mxu1 %v454_v27  ;;  %110 = vperm.xlu0 %520, %v104_v38  }
  0x12   :  { %148 = vmatpush.msra.mxu0 %v421_v29  ;;  %510 = vmatpush.msra.mxu3 %v421_v29 }
  0x13   :  { %177 = vmatpush.msra.mxu1 %v453_v32  ;;  %120 = vperm.xlu1 %521, %v106_v49  }
  0x14   :  { %149 = vmatpush.msra.mxu0 %v418_v33  ;;  %511 = vmatpush.msra.mxu3 %v418_v33 }
  0x15   :  { %178 = vmatpush.msra.mxu1 %v450_v34 }
  0x16   :  { %150 = vmatpush.msra.mxu0 %v417_v36  ;;  %512 = vmatpush.msra.mxu3 %v417_v36 }
  0x17   :  { %179 = vmatpush.msra.mxu1 %v449_v39  ;;  %400 = vmatmul.msk.f32.gmra.mxu2 %vm128_vm0, %v97_v46  ;;  %v350_v46 = vld [vmem:[%s739_s4 + $0x18] sm:$0xff] }
  0x18   :  { %151 = vmatpush.msra.mxu0 %v414_v41  ;;  %513 = vmatpush.msra.mxu3 %v414_v41  ;;  %v319_v41 = vld [vmem:[%s738_s3] sm:$0xff] }
  0x19   :  { %180 = vmatpush.msra.mxu1 %v446_v42  ;;  %115 = vperm.xlu0 %520, %v105_v54   ;;  %v320_v42 = vld [vmem:[%s738_s3 + $0x8] sm:$0xff] }
  0x1a   :  { %152 = vmatpush.msra.mxu0 %v413_v44  ;;  %514 = vmatpush.msra.mxu3 %v413_v44  ;;  %v347_v44 = vld [vmem:[%s739_s4] sm:$0xff] }
  0x1b   :  { %181 = vmatpush.msra.mxu1 %v445_v47  ;;  %125 = vperm.xlu1 %521, %v107_v0   ;;  %v349_v47 = vld [vmem:[%s739_s4 + $0x10] sm:$0xff] }
  0x1c   :  { %153 = vmatpush.msra.mxu0 %v410_v48  ;;  %515 = vmatpush.msra.mxu3 %v410_v48 }
  0x1d   :  { %182 = vmatpush.msra.mxu1 %v442_v50 }
  0x1e   :  { %154 = vmatpush.msra.mxu0 %v409_v52  ;;  %516 = vmatpush.msra.mxu3 %v409_v52 }
  0x1f   :  { %183 = vmatpush.msra.mxu1 %v441_v55  ;;  %401 = vmatmul.msk.f32.gmra.mxu2 %vm128_vm0, %v100_v59 }
  0x20   :  { %155 = vmatpush.msra.mxu0 %v406_v56  ;;  %517 = vmatpush.msra.mxu3 %v406_v56 }
  0x21   :  { %184 = vmatpush.msra.mxu1 %v438_v57 }
  0x22   :  { %156 = vmatpush.msra.mxu0 %v405_v58  ;;  %518 = vmatpush.msra.mxu3 %v405_v58 }
  0x23   :  { %185 = vmatpush.msra.mxu1 %v437_v60  ;;  %157 = vmatmul.f32.vlgmr.msra.gmra.mxu0 %v92_v61 }
  0x24   :  { %160 = vmatmul.f32.vlgmr.msra.gmra.mxu3 %v95_v62  ;;  %186 = vmatmul.f32.vlgmr.msra.gmra.mxu1 %v93_v63 }
  0x27   :  { %402 = vmatmul.msk.f32.gmra.mxu2 %vm128_vm0, %v103_v1 }
  0x2c   :  { %163 = vmatmul.f32.gmra.mxu3 %v98_v2  ;;  %189 = vmatmul.f32.gmra.mxu1 %v96_v3 }
  0x34   :  { %166 = vmatmul.f32.gmra.mxu3 %v101_v4  ;;  %192 = vmatmul.f32.gmra.mxu1 %v99_v5  ;;  %v348_v4 = vld [vmem:[%s739_s4 + $0x8] sm:$0xff] }
  0x3c   :  { %195 = vmatmul.f32.gmra.mxu1 %v102_v6 }
  0x83   :  { %v111_v9 = vpop.permute.xlu0 %110 }
  0x85   :  { %v121_v24 = vpop.permute.xlu1 %120 }
  0x8b   :  { %v116_v17 = vpop.permute.xlu0 %115 }
  0x8d   :  { %v126_v33 = vpop.permute.xlu1 %125 }
  0x92   :  { %v216_v7 = vpop.f32.mrf.mxu2 }
  0x9a   :  { %v219_v16 = vpop.f32.mrf.mxu2 }
  0xa0   :  { %v158_v10 = vpop.f32.mrf.mxu0 }
  0xa1   :  { %v159_v12 = vadd.f32 %v158_v10, %v111_v9  ;;  %v187_v13 = vpop.f32.mrf.mxu1 }
  0xa2   :  { %v222_v27 = vpop.f32.mrf.mxu2 }
  0xa3   :  { %v188_v14 = vadd.f32 %v187_v13, %v159_v12 }
  0xa5   :  { %v217_v15 = vadd.f32 %v216_v7, %v188_v14 }
  0xa7   :  { %v161_v18 = vpop.f32.mrf.mxu3  ;;  %v231_v19 = vsel %vm230_vm1, %v217_v15, 0.0 }
  0xa8   :  { %v162_v20 = vadd.f32 %v161_v18, %v116_v17  ;;  %235 = vadd.xlane.f32.xlu2 %v231_v19 }
  0xa9   :  { %v190_v21 = vpop.f32.mrf.mxu1 }
  0xaa   :  { %v191_v22 = vadd.f32 %v190_v21, %v162_v20  ;;  %v225_v37 = vpop.f32.mrf.mxu2 }
  0xac   :  { %v220_v23 = vadd.f32 %v219_v16, %v191_v22 }
  0xae   :  { %v232_v26 = vsel %vm230_vm1, %v220_v23, 0.0 }
  0xaf   :  { %v164_v25 = vpop.f32.mrf.mxu3 }
  0xb0   :  { %v165_v28 = vadd.f32 %v164_v25, %v121_v24  ;;  %237 = vadd.xlane.f32.xlu2 %v232_v26 }
  0xb1   :  { %v193_v29 = vpop.f32.mrf.mxu1 }
  0xb2   :  { %v194_v30 = vadd.f32 %v193_v29, %v165_v28 }
  0xb4   :  { %v223_v31 = vadd.f32 %v222_v27, %v194_v30 }
  0xb6   :  { %v233_v32 = vsel %vm230_vm1, %v223_v31, 0.0 }
  0xb7   :  { %v167_v34 = vpop.f32.mrf.mxu3  ;;  %239 = vadd.xlane.f32.xlu0 %v233_v32 }
  0xb8   :  { %v168_v35 = vadd.f32 %v167_v34, %v126_v33 }
  0xb9   :  { %v196_v36 = vpop.f32.mrf.mxu1 }
  0xba   :  { %v197_v38 = vadd.f32 %v196_v36, %v168_v35 }
  0xbc   :  { %v226_v39 = vadd.f32 %v225_v37, %v197_v38 }
  0xbe   :  { %v234_v40 = vsel %vm230_vm1, %v226_v39, 0.0 }
  0xbf   :  { %241 = vadd.xlane.f32.xlu1 %v234_v40 }
  0xc8   :  { %325 = vperm.xlu2 %522, %v319_v41  }
  0xcb   :  { %330 = vperm.xlu0 %520, %v320_v42  }
  0xd0   :  { %340 = vperm.xlu2 %522, %v322_v43  }
  0xd3   :  { %353 = vperm.xlu0 %520, %v347_v44  }
  0xd8   :  { %335 = vperm.xlu1 %521, %v321_v45  }
  0xdb   :  { %368 = vperm.xlu0 %520, %v350_v46  }
  0xe0   :  { %363 = vperm.xlu1 %521, %v349_v47  }
 0x11b   :  { %v236_v48 = vpop.xlane.xlu2 %235 }
 0x11c   :  { %v243_v49 = vmul.f32 0.03125, %v236_v48 }
 0x11e   :  { %v247_v50 = vsub.f32 %v217_v15, %v243_v49 }
 0x120   :  { %v251_v51 = vmul.f32 %v247_v50, %v247_v50 }
 0x122   :  { %v255_v52 = vsel %vm230_vm1, %v251_v51, 0.0 }
 0x123   :  { %259 = vadd.xlane.f32.xlu2 %v255_v52  ;;  %v238_v53 = vpop.xlane.xlu2 %237 }
 0x124   :  { %v244_v54 = vmul.f32 0.03125, %v238_v53 }
 0x126   :  { %v702_v55 = vsub.f32 %v220_v23, %v244_v54 }
 0x128   :  { %v252_v56 = vmul.f32 %v702_v55, %v702_v55 }
 0x12a   :  { %v240_v57 = vpop.xlane.xlu0 %239  ;;  %v256_v58 = vsel %vm230_vm1, %v252_v56, 0.0 }
 0x12b   :  { %v245_v59 = vmul.f32 0.03125, %v240_v57  ;;  %261 = vadd.xlane.f32.xlu2 %v256_v58  ;;  %v326_v5 = vpop.permute.xlu2 %325 }
 0x12d   :  { %v708_v60 = vsub.f32 %v223_v31, %v245_v59 }
 0x12f   :  { %v253_v61 = vmul.f32 %v708_v60, %v708_v60 }
 0x131   :  { %v257_v63 = vsel %vm230_vm1, %v253_v61, 0.0 }
 0x132   :  { %v242_v62 = vpop.xlane.xlu1 %241 }
 0x133   :  { %v246_v0 = vmul.f32 0.03125, %v242_v62  ;;  %263 = vadd.xlane.f32.xlu2 %v257_v63  ;;  %v723_v6 = vpop.permute.xlu2 %340 }
 0x135   :  { %v714_v1 = vsub.f32 %v226_v39, %v246_v0 }
 0x137   :  { %v254_v2 = vmul.f32 %v714_v1, %v714_v1 }
 0x139   :  { %v258_v3 = vsel %vm230_vm1, %v254_v2, 0.0 }
 0x13b   :  { %265 = vadd.xlane.f32.xlu2 %v258_v3 }
 0x13d   :  { %v331_v22 = vpop.permute.xlu0 %330 }
 0x145   :  { %v354_v37 = vpop.permute.xlu0 %353 }
 0x14a   :  { %v336_v49 = vpop.permute.xlu1 %335 }
 0x152   :  { %v364_v0 = vpop.permute.xlu1 %363 }
 0x153   :  { %358 = vperm.xlu2 %522, %v348_v4  }
 0x196   :  { %v260_v7 = vpop.xlane.xlu2 %259 }
 0x197   :  { %v267_v8 = vmul.f32 0.03125, %v260_v7 }
 0x199   :  { %v271_v9 = vadd.f32 1e-05, %v267_v8 }
 0x19b   :  { %523 = vrsqrt.f32 %v271_v9  ;;  %vm281_vm3 = vweird.f32 %v271_v9 }
 0x19e   :  { %v262_v10 = vpop.xlane.xlu2 %261 }
 0x19f   :  { %v268_v12 = vmul.f32 0.03125, %v262_v10 }
 0x1a1   :  { %v524_v13 = vpop.eup %523  ;;  %v272_v14 = vadd.f32 1e-05, %v268_v12 }
 0x1a2   :  { %v276_v15 = vmul.f32 %v524_v13, %v271_v9  ;;  %vm282_vm2 = vweird.f32 %v524_v13 }
 0x1a3   :  { %525 = vrsqrt.f32 %v272_v14  ;;  %vm283_vm4 = vmor %vm281_vm3, %vm282_vm2  ;;  %vm291_vm6 = vweird.f32 %v272_v14 }
 0x1a4   :  { %v277_v11 = vmul.f32 %v524_v13, %v276_v15 }
 0x1a6   :  { %v278_v16 = vmul.f32 0.5, %v277_v11  ;;  %v264_v17 = vpop.xlane.xlu2 %263 }
 0x1a7   :  { %v269_v18 = vmul.f32 0.03125, %v264_v17 }
 0x1a8   :  { %v279_v19 = vsub.f32 1.5, %v278_v16 }
 0x1a9   :  { %v526_v20 = vpop.eup %525  ;;  %v273_v21 = vadd.f32 1e-05, %v269_v18 }
 0x1aa   :  { %v280_v23 = vmul.f32 %v524_v13, %v279_v19  ;;  %v286_v24 = vmul.f32 %v526_v20, %v272_v14  ;;  %vm292_vm5 = vweird.f32 %v526_v20 }
 0x1ab   :  { %527 = vrsqrt.f32 %v273_v21  ;;  %vm293_vm7 = vmor %vm291_vm6, %vm292_vm5  ;;  %vm301_vm9 = vweird.f32 %v273_v21 }
 0x1ac   :  { %v284_v25 = vsel %vm283_vm4, %v524_v13, %v280_v23  ;;  %v287_v26 = vmul.f32 %v526_v20, %v286_v24 }
 0x1ad   :  { %v315_v27 = vmul.f32 %v284_v25, %v247_v50 }
 0x1ae   :  { %v288_v28 = vmul.f32 0.5, %v287_v26  ;;  %v266_v29 = vpop.xlane.xlu2 %265 }
 0x1af   :  { %v270_v30 = vmul.f32 0.03125, %v266_v29  ;;  %v343_v33 = vmul.f32 %v326_v5, %v315_v27  ;;  %v369_v5 = vpop.permute.xlu0 %368 }
 0x1b0   :  { %v289_v31 = vsub.f32 1.5, %v288_v28 }
 0x1b1   :  { %v528_v32 = vpop.eup %527  ;;  %v274_v34 = vadd.f32 1e-05, %v270_v30  ;;  %v371_v41 = vadd.f32 %v354_v37, %v343_v33 }
 0x1b2   :  { %v296_v35 = vmul.f32 %v528_v32, %v273_v21  ;;  %v290_v36 = vmul.f32 %v526_v20, %v289_v31  ;;  %vm302_vm8 = vweird.f32 %v528_v32 }
 0x1b3   :  { %529 = vrsqrt.f32 %v274_v34  ;;  %v379_v47 = vmul.f32 0.2, %v371_v41  ;;  %vm375_vm10 = vcmp.ge.f32.partialorder %v371_v41, 0.0  ;;  %vm303_vm11 = vmor %vm301_vm9, %vm302_vm8  ;;  %vm311_vm14 = vweird.f32 %v274_v34 }
 0x1b4   :  { %v297_v38 = vmul.f32 %v528_v32, %v296_v35  ;;  %v294_v39 = vsel %vm293_vm7, %v526_v20, %v290_v36 }
 0x1b5   :  { %v316_v40 = vmul.f32 %v294_v39, %v702_v55  ;;  %v383_v56 = vsel %vm375_vm10, %v371_v41, %v379_v47 }
 0x1b6   :  { %v298_v42 = vmul.f32 0.5, %v297_v38  ;;  %v359_v45 = vpop.permute.xlu2 %358 }
 0x1b7   :  { %v344_v43 = vmul.f32 %v331_v22, %v316_v40 }
 0x1b8   :  { %v299_v44 = vsub.f32 1.5, %v298_v42 }
 0x1b9   :  { %v530_v46 = vpop.eup %529  ;;  %v372_v48 = vadd.f32 %v359_v45, %v344_v43 }
 0x1ba   :  { %v300_v50 = vmul.f32 %v528_v32, %v299_v44  ;;  %v306_v51 = vmul.f32 %v530_v46, %v274_v34  ;;  %vm312_vm13 = vweird.f32 %v530_v46 }
 0x1bb   :  { %vm376_vm12 = vcmp.ge.f32.partialorder %v372_v48, 0.0  ;;  %v380_v52 = vmul.f32 0.2, %v372_v48  ;;  %vm313_vm15 = vmor %vm311_vm14, %vm312_vm13 }
 0x1bc   :  { %v304_v53 = vsel %vm303_vm11, %v528_v32, %v300_v50  ;;  %v307_v54 = vmul.f32 %v530_v46, %v306_v51 }
 0x1bd   :  { %v317_v55 = vmul.f32 %v304_v53, %v708_v60  ;;  %v384_v57 = vsel %vm376_vm12, %v372_v48, %v380_v52 }
 0x1be   :  { %v308_v58 = vmul.f32 0.5, %v307_v54  ;;  %v478_v59 = vpack.c.bf16 %v384_v57, %v383_v56 }
 0x1bf   :  { %v345_v62 = vmul.f32 %v336_v49, %v317_v55 }
 0x1c0   :  { %v309_v61 = vsub.f32 1.5, %v308_v58  ;;  %479 = vst [vmem:[%s740_s5] sm:$0xff] %v478_v59  }
 0x1c1   :  { %v373_v3 = vadd.f32 %v364_v0, %v345_v62 }
 0x1c2   :  { %v310_v63 = vmul.f32 %v530_v46, %v309_v61 }
 0x1c3   :  { %v381_v8 = vmul.f32 0.2, %v373_v3  ;;  %vm377_vm0 = vcmp.ge.f32.partialorder %v373_v3, 0.0 }
 0x1c4   :  { %v314_v2 = vsel %vm313_vm15, %v530_v46, %v310_v63 }
 0x1c5   :  { %v318_v4 = vmul.f32 %v314_v2, %v714_v1  ;;  %v385_v10 = vsel %vm377_vm0, %v373_v3, %v381_v8 }
 0x1c7   :  { %v346_v60 = vmul.f32 %v723_v6, %v318_v4 }
 0x1c9   :  { %v374_v7 = vadd.f32 %v369_v5, %v346_v60 }
 0x1cb   :  { %vm378_vm1 = vcmp.ge.f32.partialorder %v374_v7, 0.0  ;;  %v382_v9 = vmul.f32 0.2, %v374_v7 }
 0x1cd   :  { %v386_v12 = vsel %vm378_vm1, %v374_v7, %v382_v9 }
 0x1ce   :  { %v483_v13 = vpack.c.bf16 %v386_v12, %v385_v10 }
 0x1d0   :  { %502 = vst [vmem:[%s740_s5 + $0x8] sm:$0xff] %v483_v13  }

// kernel: discriminator_edges_forward.9
= control target key start
LH: loop header
LB: loop body
LE: loop exit
PB: predicated region body
PF: predicated region fallthrough
CT: control target
= control target key end

     0   :  { %s533_s0 = inlined_call_operand.vmem [shape: bf16[512,128], index: 0, kind: input, shape index: {}]   ;;  %s534_s2 = inlined_call_operand.<no memory space> [shape: f32[1,1], index: 2, kind: input, shape index: {}]   ;;  %s535_s1 = inlined_call_operand.vmem [shape: f32[1,512], index: 1, kind: input, shape index: {}]   ;;  %s536_s3 = inlined_call_operand.vmem [shape: f32[1,128], index: 3, kind: output, shape index: {}]  }
   0x1   :  { %v396_v0 = vld [vmem:[%s533_s0 + $0xb8] sm:$0xff]   ;;  %v395_v8 = vld [vmem:[%s533_s0 + $0xb0] sm:$0xff]   ;;  %v394_v20 = vld [vmem:[%s533_s0 + $0xa8] sm:$0xff]  }
   0x2   :  { %v380_v1 = vld [vmem:[%s533_s0 + $0x38] sm:$0xff]   ;;  %v341_v3 = vunpack.c.h.bf16 %v396_v0  ;;  %v340_v5 = vunpack.c.l.bf16 %v396_v0  ;;  %v379_v9 = vld [vmem:[%s533_s0 + $0x30] sm:$0xff]   ;;  %v337_v15 = vunpack.c.h.bf16 %v395_v8  ;;  %v378_v21 = vld [vmem:[%s533_s0 + $0x28] sm:$0xff]   ;;  %v336_v22 = vunpack.c.l.bf16 %v395_v8 }
   0x3   :  { %v404_v2 = vld [vmem:[%s533_s0 + $0xf8] sm:$0xff]   ;;  %v277_v4 = vunpack.c.h.bf16 %v380_v1  ;;  %v276_v10 = vunpack.c.l.bf16 %v380_v1  ;;  %v403_v13 = vld [vmem:[%s533_s0 + $0xf0] sm:$0xff]   ;;  %v273_v16 = vunpack.c.h.bf16 %v379_v9  ;;  %v272_v23 = vunpack.c.l.bf16 %v379_v9  ;;  %v402_v24 = vld [vmem:[%s533_s0 + $0xe8] sm:$0xff]  }
   0x4   :  { %v373_v6 = vunpack.c.h.bf16 %v404_v2  ;;  %v388_v7 = vld [vmem:[%s533_s0 + $0x78] sm:$0xff]   ;;  %v372_v12 = vunpack.c.l.bf16 %v404_v2  ;;  %v387_v14 = vld [vmem:[%s533_s0 + $0x70] sm:$0xff]   ;;  %201 = vmatpush.msra.mxu2 %v341_v3  ;;  %v369_v18 = vunpack.c.h.bf16 %v403_v13  ;;  %v386_v25 = vld [vmem:[%s533_s0 + $0x68] sm:$0xff]   ;;  %v368_v26 = vunpack.c.l.bf16 %v403_v13 }
   0x5   :  { %v309_v11 = vunpack.c.h.bf16 %v388_v7  ;;  %161 = vmatpush.msra.mxu0 %v277_v4  ;;  %v308_v17 = vunpack.c.l.bf16 %v388_v7  ;;  %v305_v19 = vunpack.c.h.bf16 %v387_v14  ;;  %v304_v27 = vunpack.c.l.bf16 %v387_v14  ;;  %v393_v32 = vld [vmem:[%s533_s0 + $0xa0] sm:$0xff]   ;;  %v392_v44 = vld [vmem:[%s533_s0 + $0x98] sm:$0xff]   ;;  %v391_v56 = vld [vmem:[%s533_s0 + $0x90] sm:$0xff]  }
   0x6   :  { %221 = vmatpush.msra.mxu3 %v373_v6  ;;  %202 = vmatpush.msra.mxu2 %v340_v5  ;;  %v333_v28 = vunpack.c.h.bf16 %v394_v20  ;;  %v269_v29 = vunpack.c.h.bf16 %v378_v21  ;;  %v365_v30 = vunpack.c.h.bf16 %v402_v24  ;;  %v301_v31 = vunpack.c.h.bf16 %v386_v25  ;;  %v377_v33 = vld [vmem:[%s533_s0 + $0x20] sm:$0xff]   ;;  %v376_v45 = vld [vmem:[%s533_s0 + $0x18] sm:$0xff]   ;;  %v375_v57 = vld [vmem:[%s533_s0 + $0x10] sm:$0xff]  }
   0x7   :  { %181 = vmatpush.msra.mxu1 %v309_v11  ;;  %162 = vmatpush.msra.mxu0 %v276_v10  ;;  %v332_v34 = vunpack.c.l.bf16 %v394_v20  ;;  %v268_v35 = vunpack.c.l.bf16 %v378_v21  ;;  %v401_v36 = vld [vmem:[%s533_s0 + $0xe0] sm:$0xff]   ;;  %v364_v38 = vunpack.c.l.bf16 %v402_v24  ;;  %v300_v39 = vunpack.c.l.bf16 %v386_v25  ;;  %v400_v48 = vld [vmem:[%s533_s0 + $0xd8] sm:$0xff]   ;;  %v399_v60 = vld [vmem:[%s533_s0 + $0xd0] sm:$0xff]  }
   0x8   :  { %222 = vmatpush.msra.mxu3 %v372_v12  ;;  %203 = vmatpush.msra.mxu2 %v337_v15  ;;  %v385_v37 = vld [vmem:[%s533_s0 + $0x60] sm:$0xff]   ;;  %v329_v40 = vunpack.c.h.bf16 %v393_v32  ;;  %v265_v41 = vunpack.c.h.bf16 %v377_v33  ;;  %v361_v42 = vunpack.c.h.bf16 %v401_v36  ;;  %v328_v46 = vunpack.c.l.bf16 %v393_v32  ;;  %v384_v49 = vld [vmem:[%s533_s0 + $0x58] sm:$0xff]   ;;  %v383_v61 = vld [vmem:[%s533_s0 + $0x50] sm:$0xff]  }
   0x9   :  { %182 = vmatpush.msra.mxu1 %v308_v17  ;;  %163 = vmatpush.msra.mxu0 %v273_v16  ;;  %v297_v43 = vunpack.c.h.bf16 %v385_v37  ;;  %v264_v47 = vunpack.c.l.bf16 %v377_v33  ;;  %v360_v50 = vunpack.c.l.bf16 %v401_v36  ;;  %v296_v51 = vunpack.c.l.bf16 %v385_v37  ;;  %v390_v5 = vld [vmem:[%s533_s0 + $0x88] sm:$0xff]   ;;  %v389_v17 = vld [vmem:[%s533_s0 + $0x80] sm:$0xff]  }
   0xa   :  { %223 = vmatpush.msra.mxu3 %v369_v18  ;;  %204 = vmatpush.msra.mxu2 %v336_v22  ;;  %v325_v52 = vunpack.c.h.bf16 %v392_v44  ;;  %v261_v53 = vunpack.c.h.bf16 %v376_v45  ;;  %v357_v54 = vunpack.c.h.bf16 %v400_v48  ;;  %v293_v55 = vunpack.c.h.bf16 %v384_v49  ;;  %v374_v6 = vld [vmem:[%s533_s0 + $0x8] sm:$0xff]   ;;  %v247_v18 = vld [vmem:[%s533_s0] sm:$0xff]  }
   0xb   :  { %183 = vmatpush.msra.mxu1 %v305_v19  ;;  %164 = vmatpush.msra.mxu0 %v272_v23  ;;  %v324_v58 = vunpack.c.l.bf16 %v392_v44  ;;  %v260_v59 = vunpack.c.l.bf16 %v376_v45  ;;  %v356_v62 = vunpack.c.l.bf16 %v400_v48  ;;  %v292_v63 = vunpack.c.l.bf16 %v384_v49  ;;  %v398_v9 = vld [vmem:[%s533_s0 + $0xc8] sm:$0xff]   ;;  %v397_v21 = vld [vmem:[%s533_s0 + $0xc0] sm:$0xff]  }
   0xc   :  { %224 = vmatpush.msra.mxu3 %v368_v26  ;;  %205 = vmatpush.msra.mxu2 %v333_v28  ;;  %v8_v0 = vstv %s534_s2  ;;  %v321_v1 = vunpack.c.h.bf16 %v391_v56  ;;  %v257_v2 = vunpack.c.h.bf16 %v375_v57  ;;  %v353_v3 = vunpack.c.h.bf16 %v399_v60  ;;  %v382_v10 = vld [vmem:[%s533_s0 + $0x48] sm:$0xff]   ;;  %v381_v22 = vld [vmem:[%s533_s0 + $0x40] sm:$0xff]  }
   0xd   :  { %184 = vmatpush.msra.mxu1 %v304_v27  ;;  %165 = vmatpush.msra.mxu0 %v269_v29  ;;  %9 = vst [vmem:[#allocation2] sm:$0x1] %v8_v0  ;;  %v289_v4 = vunpack.c.h.bf16 %v383_v61  ;;  %v320_v7 = vunpack.c.l.bf16 %v391_v56  ;;  %v256_v8 = vunpack.c.l.bf16 %v375_v57  ;;  %v352_v11 = vunpack.c.l.bf16 %v399_v60  ;;  %v144_v27 = vld [vmem:[%s535_s1] sm:$0xf] }
   0xe   :  { %225 = vmatpush.msra.mxu3 %v365_v30  ;;  %206 = vmatpush.msra.mxu2 %v332_v34  ;;  %v288_v12 = vunpack.c.l.bf16 %v383_v61  ;;  %v317_v13 = vunpack.c.h.bf16 %v390_v5  ;;  %v253_v14 = vunpack.c.h.bf16 %v374_v6  ;;  %v349_v15 = vunpack.c.h.bf16 %v398_v9 }
   0xf   :  { %185 = vmatpush.msra.mxu1 %v301_v31  ;;  %166 = vmatpush.msra.mxu0 %v268_v35  ;;  %v285_v16 = vunpack.c.h.bf16 %v382_v10  ;;  %v316_v19 = vunpack.c.l.bf16 %v390_v5  ;;  %v252_v20 = vunpack.c.l.bf16 %v374_v6  ;;  %v348_v23 = vunpack.c.l.bf16 %v398_v9 }
  0x10   :  { %226 = vmatpush.msra.mxu3 %v364_v38  ;;  %207 = vmatpush.msra.mxu2 %v329_v40  ;;  %v284_v24 = vunpack.c.l.bf16 %v382_v10  ;;  %v313_v25 = vunpack.c.h.bf16 %v389_v17  ;;  %v249_v26 = vunpack.c.h.bf16 %v247_v18  ;;  %v345_v28 = vunpack.c.h.bf16 %v397_v21 }
  0x11   :  { %186 = vmatpush.msra.mxu1 %v300_v39  ;;  %167 = vmatpush.msra.mxu0 %v265_v41  ;;  %v281_v29 = vunpack.c.h.bf16 %v381_v22  ;;  %v312_v30 = vunpack.c.l.bf16 %v389_v17  ;;  %v248_v31 = vunpack.c.l.bf16 %v247_v18  ;;  %v155_v32 = vperm.slane %v144_v27, 2 }
  0x12   :  { %227 = vmatpush.msra.mxu3 %v361_v42  ;;  %208 = vmatpush.msra.mxu2 %v328_v46  ;;  %v344_v33 = vunpack.c.l.bf16 %v397_v21  ;;  %v153_v34 = vperm.slane %v144_v27, 0  ;;  %v156_v35 = vperm.slane %v144_v27, 3  ;;  %v280_v36 = vunpack.c.l.bf16 %v381_v22 }
  0x13   :  { %187 = vmatpush.msra.mxu1 %v297_v43  ;;  %168 = vmatpush.msra.mxu0 %v264_v47  ;;  %v154_v37 = vperm.slane %v144_v27, 1  ;;  %v407_v39 = vmov 0  }
  0x14   :  { %228 = vmatpush.msra.mxu3 %v360_v50  ;;  %209 = vmatpush.msra.mxu2 %v325_v52  ;;  %v145_v38 = vld [vmem:[#allocation2] sm:$0x1] }
  0x15   :  { %188 = vmatpush.msra.mxu1 %v296_v51  ;;  %169 = vmatpush.msra.mxu0 %v261_v53 }
  0x16   :  { %229 = vmatpush.msra.mxu3 %v357_v54  ;;  %210 = vmatpush.msra.mxu2 %v324_v58 }
  0x17   :  { %189 = vmatpush.msra.mxu1 %v293_v55  ;;  %170 = vmatpush.msra.mxu0 %v260_v59 }
  0x18   :  { %230 = vmatpush.msra.mxu3 %v356_v62  ;;  %211 = vmatpush.msra.mxu2 %v321_v1 }
  0x19   :  { %190 = vmatpush.msra.mxu1 %v292_v63  ;;  %171 = vmatpush.msra.mxu0 %v257_v2 }
  0x1a   :  { %231 = vmatpush.msra.mxu3 %v353_v3  ;;  %212 = vmatpush.msra.mxu2 %v320_v7 }
  0x1b   :  { %191 = vmatpush.msra.mxu1 %v289_v4  ;;  %172 = vmatpush.msra.mxu0 %v256_v8 }
  0x1c   :  { %232 = vmatpush.msra.mxu3 %v352_v11  ;;  %213 = vmatpush.msra.mxu2 %v317_v13 }
  0x1d   :  { %192 = vmatpush.msra.mxu1 %v288_v12  ;;  %173 = vmatpush.msra.mxu0 %v253_v14 }
  0x1e   :  { %233 = vmatpush.msra.mxu3 %v349_v15  ;;  %214 = vmatpush.msra.mxu2 %v316_v19 }
  0x1f   :  { %193 = vmatpush.msra.mxu1 %v285_v16  ;;  %174 = vmatpush.msra.mxu0 %v252_v20 }
  0x20   :  { %234 = vmatpush.msra.mxu3 %v348_v23  ;;  %215 = vmatpush.msra.mxu2 %v313_v25 }
  0x21   :  { %194 = vmatpush.msra.mxu1 %v284_v24  ;;  %175 = vmatpush.msra.mxu0 %v249_v26 }
  0x22   :  { %235 = vmatpush.msra.mxu3 %v345_v28  ;;  %216 = vmatpush.msra.mxu2 %v312_v30 }
  0x23   :  { %195 = vmatpush.msra.mxu1 %v281_v29  ;;  %176 = vmatpush.msra.mxu0 %v248_v31 }
  0x24   :  { %217 = vmatmul.f32.vlgmr.msra.gmra.mxu2 %v155_v32  ;;  %236 = vmatpush.msra.mxu3 %v344_v33 }
  0x25   :  { %177 = vmatmul.f32.vlgmr.msra.gmra.mxu0 %v153_v34  ;;  %237 = vmatmul.f32.vlgmr.msra.gmra.mxu3 %v156_v35 }
  0x26   :  { %196 = vmatpush.msra.mxu1 %v280_v36  ;;  %406 = vset.pattern.permute.xlu0 %v407_v39 }
  0x27   :  { %197 = vmatmul.f32.vlgmr.msra.gmra.mxu1 %v154_v37  ;;  %148 = vperm.xlu0 %406, %v145_v38  }
  0x99   :  { %v149_v40 = vpop.permute.xlu0 %148 }
  0x9a   :  { %v151_v41 = vperm.slane %v149_v40, 0 }
  0xa2   :  { %v178_v42 = vpop.f32.mrf.mxu0 }
  0xa3   :  { %v179_v43 = vadd.f32 %v178_v42, %v151_v41 }
  0xa4   :  { %v198_v44 = vpop.f32.mrf.mxu1 }
  0xa5   :  { %v199_v45 = vadd.f32 %v198_v44, %v179_v43 }
  0xa7   :  { %v218_v46 = vpop.f32.mrf.mxu2 }
  0xa8   :  { %v219_v47 = vadd.f32 %v218_v46, %v199_v45  ;;  %v238_v48 = vpop.f32.mrf.mxu3 }
  0xaa   :  { %v239_v49 = vadd.f32 %v238_v48, %v219_v47 }
  0xac   :  { %241 = vst [vmem:[%s536_s3] sm:$0x1] %v239_v49 }

</bundles_post_ra>
